<compile_context>
chip_gen: v7x
topology: tpu7x:2x2x1
jax: 0.10.0
libtpu: 0.0.40
codegen_flags: <defaults>
</compile_context>

<pallas_src>
import functools

import jax
import jax.numpy as jnp
import numpy as np
from jax.experimental import pallas as pl
from jax.experimental.pallas import tpu as pltpu


def _softplus_beta100(x):
    # torch.nn.Softplus(beta=100, threshold=20):
    #   y = x                        if beta*x > threshold
    #   y = log1p(exp(beta*x))/beta  otherwise
    bx = 100.0 * x
    safe = jnp.minimum(bx, 20.0)  # avoid overflow in the un-selected branch
    # * 0.01 instead of / 100.0: keeps the VALU slot clean (exp/log1p go to EUP).
    return jnp.where(bx > 20.0, x, jnp.log1p(jnp.exp(safe)) * 0.01)


def _sdf_mlp_kernel(x_ref, w0_ref, b0_ref, wh_ref, bh_ref, wo_ref, bo_ref,
                    out_ref, *, n_hidden_layers):
    # x_ref:  (3, TQ)          transposed query-point tile (lane axis = points)
    # w0_ref: (H, 3),  b0_ref: (H, 1)
    # wh_ref: (L, H, H) in (out, in) layout, bh_ref: (L, H, 1)
    # wo_ref: (1, H),  bo_ref: (1, 1)
    # out_ref: (1, TQ)
    x = x_ref[...].astype(jnp.float32)

    # h has shape (H, TQ): lane-dense activations.
    h = jnp.dot(w0_ref[...], x, preferred_element_type=jnp.float32) + b0_ref[...]
    h = _softplus_beta100(h)

    for i in range(n_hidden_layers):  # static unroll (small fixed depth)
        h = jnp.dot(wh_ref[i], h, preferred_element_type=jnp.float32) + bh_ref[i]
        h = _softplus_beta100(h)

    sdf = jnp.dot(wo_ref[...], h, preferred_element_type=jnp.float32) + bo_ref[...]
    out_ref[...] = sdf.astype(out_ref.dtype)  # (1, TQ) unmasked lane-dense store


def _round_up(x, m):
    return ((x + m - 1) // m) * m


def sdf_predictor_forward(query_points, params, *, tile_q=1024):
    """query_points: (Q, 3) float32. Returns (Q, 1) float32."""
    w0, b0, wh, bh, wo, bo = params
    Q, _ = query_points.shape
    n_layers, H, _ = wh.shape

    # Cap the tile so small inputs still produce a multi-step parallel grid
    # (feeds both TensorCores on v7x); keep it a multiple of 128 for lane
    # density.  At tile_q<=4096 total VMEM use is <1 MiB, far under any limit.
    tile_q = max(128, min(tile_q, _round_up(Q, 128)))
    Q_pad = _round_up(Q, tile_q)

    # Transposed, lane-dense query layout: (3, Q_pad).
    x_t = query_points.T
    if Q_pad != Q:
        x_t = jnp.pad(x_t, ((0, 0), (0, Q_pad - Q)))

    grid = (Q_pad // tile_q,)
    kernel = functools.partial(_sdf_mlp_kernel, n_hidden_layers=n_layers)

    out = pl.pallas_call(
        kernel,
        out_shape=jax.ShapeDtypeStruct((1, Q_pad), jnp.float32),
        grid_spec=pltpu.PrefetchScalarGridSpec(
            num_scalar_prefetch=0,
            grid=grid,
            in_specs=[
                pl.BlockSpec((3, tile_q), lambda i: (0, i)),          # queries^T
                pl.BlockSpec((H, 3), lambda i: (0, 0)),               # W0 (out,in)
                pl.BlockSpec((H, 1), lambda i: (0, 0)),               # b0
                pl.BlockSpec((n_layers, H, H), lambda i: (0, 0, 0)),  # hidden W
                pl.BlockSpec((n_layers, H, 1), lambda i: (0, 0, 0)),  # hidden b
                pl.BlockSpec((1, H), lambda i: (0, 0)),               # Wout
                pl.BlockSpec((1, 1), lambda i: (0, 0)),               # bout
            ],
            out_specs=pl.BlockSpec((1, tile_q), lambda i: (0, i)),    # lane-dense
        ),
        compiler_params=pltpu.CompilerParams(
            dimension_semantics=("parallel",)),
    )(x_t, w0, b0, wh, bh, wo, bo)

    # (1, Q_pad) slab -> (Q, 1) as the module specifies.
    return out[:, :Q].T


def init_params(key, radius, n_dim_hidden=32, n_hidden_layers=8):
    """Deterministic init mirroring the PyTorch module's __init__.

    All weights are kept in PyTorch (out_features, in_features) layout, which
    is exactly what the transposed kernel (h = W @ h + b) wants.
    """
    std = np.sqrt(2.0) / np.sqrt(n_dim_hidden)
    keys = jax.random.split(key, 2 + n_hidden_layers)

    # extract_feature_query: Linear(3, H); weight (H, 3) ~ N(0, std), bias = 0
    w0 = jax.random.normal(keys[0], (n_dim_hidden, 3), jnp.float32) * std
    b0 = jnp.zeros((n_dim_hidden, 1), jnp.float32)

    # linear_relu_stack: 1 + 7 = 8 Linear(H, H) layers, N(0, std), bias = 0
    wh = jnp.stack(
        [jax.random.normal(keys[1 + i], (n_dim_hidden, n_dim_hidden),
                           jnp.float32) * std
         for i in range(n_hidden_layers)], axis=0)                # (L, H, H)
    bh = jnp.zeros((n_hidden_layers, n_dim_hidden, 1), jnp.float32)

    # calculate_SDF: Linear(H, 1); weight ~ N(sqrt(pi)/sqrt(H), 1e-6), bias = -radius
    wo = (jax.random.normal(keys[-1], (1, n_dim_hidden), jnp.float32) * 1e-6
          + np.sqrt(np.pi) / np.sqrt(n_dim_hidden))               # (1, H)
    bo = jnp.full((1, 1), -radius, jnp.float32)

    return w0, b0, wh, bh, wo, bo


def _reference_forward(query_points, params):
    """Pure-JAX reference (standard PyTorch y = x @ W^T + b semantics)."""
    w0, b0, wh, bh, wo, bo = params
    h = _softplus_beta100(query_points @ w0.T + b0.T)
    for i in range(wh.shape[0]):
        h = _softplus_beta100(h @ wh[i].T + bh[i].T)
    return h @ wo.T + bo.T


if __name__ == "__main__":
    radius = 0.5
    n_dim_hidden = 32
    Q = 1000  # deliberately not a multiple of the tile to exercise padding

    key = jax.random.PRNGKey(0)
    k_params, k_points = jax.random.split(key)

    params = init_params(k_params, radius, n_dim_hidden=n_dim_hidden)
    query_points = jax.random.uniform(
        k_points, (Q, 3), jnp.float32, minval=-1.0, maxval=1.0)

    # tile_q=256 -> Q_pad=1024, grid of 4 parallel steps (keeps both v7x TCs busy).
    sdf = sdf_predictor_forward(query_points, params, tile_q=256)
    sdf = jax.block_until_ready(sdf)

    assert sdf.shape == (Q, 1), sdf.shape

    ref = _reference_forward(query_points, params)
    np.testing.assert_allclose(np.asarray(sdf), np.asarray(ref),
                               rtol=1e-5, atol=1e-5)

    print("KERNEL_OK")
</pallas_src>

<mosaic_0001>
module attributes {stable_mosaic.version = 11 : i64} {
  func.func @_sdf_mlp_kernel(%arg0: i32, %arg1: memref<3x256xf32, #tpu.memory_space<vmem>>, %arg2: memref<32x3xf32, #tpu.memory_space<vmem>>, %arg3: memref<32x1xf32, #tpu.memory_space<vmem>>, %arg4: memref<8x32x32xf32, #tpu.memory_space<vmem>>, %arg5: memref<8x32x1xf32, #tpu.memory_space<vmem>>, %arg6: memref<1x32xf32, #tpu.memory_space<vmem>>, %arg7: memref<1x1xf32, #tpu.memory_space<vmem>>, %arg8: memref<1x256xf32, #tpu.memory_space<vmem>>) attributes {dimension_semantics = [#tpu.dimension_semantics<parallel>], iteration_bounds = array<i64: 4>, scalar_prefetch = 0 : i64, scratch_operands = 0 : i64, tpu.core_type = #tpu.core_type<tc>, window_params = [{transform_indices = @transform_0, window_bounds = array<i64: 3, 256>}, {pipeline_mode = #tpu.pipeline_mode<synchronous>, transform_indices = @transform_1, window_bounds = array<i64: 32, 3>}, {pipeline_mode = #tpu.pipeline_mode<synchronous>, transform_indices = @transform_2, window_bounds = array<i64: 32, 1>}, {pipeline_mode = #tpu.pipeline_mode<synchronous>, transform_indices = @transform_3, window_bounds = array<i64: 8, 32, 32>}, {pipeline_mode = #tpu.pipeline_mode<synchronous>, transform_indices = @transform_4, window_bounds = array<i64: 8, 32, 1>}, {pipeline_mode = #tpu.pipeline_mode<synchronous>, transform_indices = @transform_5, window_bounds = array<i64: 1, 32>}, {pipeline_mode = #tpu.pipeline_mode<synchronous>, transform_indices = @transform_6, window_bounds = array<i64: 1, 1>}, {transform_indices = @transform_7, window_bounds = array<i64: 1, 256>}]} {
    %c0 = arith.constant 0 : index
    %c0_0 = arith.constant 0 : index
    %0 = vector.load %arg1[%c0, %c0_0] : memref<3x256xf32, #tpu.memory_space<vmem>>, vector<3x256xf32>
    %c0_1 = arith.constant 0 : index
    %c0_2 = arith.constant 0 : index
    %1 = vector.load %arg2[%c0_1, %c0_2] : memref<32x3xf32, #tpu.memory_space<vmem>>, vector<32x3xf32>
    %cst = arith.constant dense<0.000000e+00> : vector<32x256xf32>
    %2 = tpu.matmul %1, %0, %cst {dimension_numbers = #tpu.dot_dimension_numbers<[1], [0], [0], [1], [0, 0, 1, 1], [], []>} : vector<32x3xf32>, vector<3x256xf32>, vector<32x256xf32> -> vector<32x256xf32>
    %c0_3 = arith.constant 0 : index
    %c0_4 = arith.constant 0 : index
    %3 = vector.load %arg3[%c0_3, %c0_4] : memref<32x1xf32, #tpu.memory_space<vmem>>, vector<32x1xf32>
    %4 = vector.broadcast %3 : vector<32x1xf32> to vector<32x256xf32>
    %5 = arith.addf %2, %4 : vector<32x256xf32>
    %cst_5 = arith.constant 1.000000e+02 : f32
    %6 = vector.broadcast %cst_5 : f32 to vector<32x256xf32>
    %7 = arith.mulf %6, %5 : vector<32x256xf32>
    %cst_6 = arith.constant 2.000000e+01 : f32
    %8 = vector.broadcast %cst_6 : f32 to vector<32x256xf32>
    %9 = arith.minimumf %7, %8 : vector<32x256xf32>
    %cst_7 = arith.constant 2.000000e+01 : f32
    %10 = vector.broadcast %cst_7 : f32 to vector<32x256xf32>
    %11 = arith.cmpf ogt, %7, %10 : vector<32x256xf32>
    %12 = math.exp %9 : vector<32x256xf32>
    %13 = math.log1p %12 : vector<32x256xf32>
    %cst_8 = arith.constant 0.00999999977 : f32
    %14 = vector.broadcast %cst_8 : f32 to vector<32x256xf32>
    %15 = arith.mulf %13, %14 : vector<32x256xf32>
    %16 = arith.select %11, %5, %15 : vector<32x256xi1>, vector<32x256xf32>
    %c0_9 = arith.constant 0 : index
    %c0_10 = arith.constant 0 : index
    %c0_11 = arith.constant 0 : index
    %17 = vector.load %arg4[%c0_9, %c0_10, %c0_11] : memref<8x32x32xf32, #tpu.memory_space<vmem>>, vector<1x32x32xf32>
    %18 = vector.shape_cast %17 : vector<1x32x32xf32> to vector<32x32xf32>
    %cst_12 = arith.constant dense<0.000000e+00> : vector<32x256xf32>
    %19 = tpu.matmul %18, %16, %cst_12 {dimension_numbers = #tpu.dot_dimension_numbers<[1], [0], [0], [1], [0, 0, 1, 1], [], []>} : vector<32x32xf32>, vector<32x256xf32>, vector<32x256xf32> -> vector<32x256xf32>
    %c0_13 = arith.constant 0 : index
    %c0_14 = arith.constant 0 : index
    %c0_15 = arith.constant 0 : index
    %20 = vector.load %arg5[%c0_13, %c0_14, %c0_15] : memref<8x32x1xf32, #tpu.memory_space<vmem>>, vector<1x32x1xf32>
    %21 = vector.shape_cast %20 : vector<1x32x1xf32> to vector<32x1xf32>
    %22 = vector.broadcast %21 : vector<32x1xf32> to vector<32x256xf32>
    %23 = arith.addf %19, %22 : vector<32x256xf32>
    %cst_16 = arith.constant 1.000000e+02 : f32
    %24 = vector.broadcast %cst_16 : f32 to vector<32x256xf32>
    %25 = arith.mulf %24, %23 : vector<32x256xf32>
    %cst_17 = arith.constant 2.000000e+01 : f32
    %26 = vector.broadcast %cst_17 : f32 to vector<32x256xf32>
    %27 = arith.minimumf %25, %26 : vector<32x256xf32>
    %cst_18 = arith.constant 2.000000e+01 : f32
    %28 = vector.broadcast %cst_18 : f32 to vector<32x256xf32>
    %29 = arith.cmpf ogt, %25, %28 : vector<32x256xf32>
    %30 = math.exp %27 : vector<32x256xf32>
    %31 = math.log1p %30 : vector<32x256xf32>
    %cst_19 = arith.constant 0.00999999977 : f32
    %32 = vector.broadcast %cst_19 : f32 to vector<32x256xf32>
    %33 = arith.mulf %31, %32 : vector<32x256xf32>
    %34 = arith.select %29, %23, %33 : vector<32x256xi1>, vector<32x256xf32>
    %c1 = arith.constant 1 : index
    %c0_20 = arith.constant 0 : index
    %c0_21 = arith.constant 0 : index
    %35 = vector.load %arg4[%c1, %c0_20, %c0_21] : memref<8x32x32xf32, #tpu.memory_space<vmem>>, vector<1x32x32xf32>
    %36 = vector.shape_cast %35 : vector<1x32x32xf32> to vector<32x32xf32>
    %cst_22 = arith.constant dense<0.000000e+00> : vector<32x256xf32>
    %37 = tpu.matmul %36, %34, %cst_22 {dimension_numbers = #tpu.dot_dimension_numbers<[1], [0], [0], [1], [0, 0, 1, 1], [], []>} : vector<32x32xf32>, vector<32x256xf32>, vector<32x256xf32> -> vector<32x256xf32>
    %c1_23 = arith.constant 1 : index
    %c0_24 = arith.constant 0 : index
    %c0_25 = arith.constant 0 : index
    %38 = vector.load %arg5[%c1_23, %c0_24, %c0_25] : memref<8x32x1xf32, #tpu.memory_space<vmem>>, vector<1x32x1xf32>
    %39 = vector.shape_cast %38 : vector<1x32x1xf32> to vector<32x1xf32>
    %40 = vector.broadcast %39 : vector<32x1xf32> to vector<32x256xf32>
    %41 = arith.addf %37, %40 : vector<32x256xf32>
    %cst_26 = arith.constant 1.000000e+02 : f32
    %42 = vector.broadcast %cst_26 : f32 to vector<32x256xf32>
    %43 = arith.mulf %42, %41 : vector<32x256xf32>
    %cst_27 = arith.constant 2.000000e+01 : f32
    %44 = vector.broadcast %cst_27 : f32 to vector<32x256xf32>
    %45 = arith.minimumf %43, %44 : vector<32x256xf32>
    %cst_28 = arith.constant 2.000000e+01 : f32
    %46 = vector.broadcast %cst_28 : f32 to vector<32x256xf32>
    %47 = arith.cmpf ogt, %43, %46 : vector<32x256xf32>
    %48 = math.exp %45 : vector<32x256xf32>
    %49 = math.log1p %48 : vector<32x256xf32>
    %cst_29 = arith.constant 0.00999999977 : f32
    %50 = vector.broadcast %cst_29 : f32 to vector<32x256xf32>
    %51 = arith.mulf %49, %50 : vector<32x256xf32>
    %52 = arith.select %47, %41, %51 : vector<32x256xi1>, vector<32x256xf32>
    %c2 = arith.constant 2 : index
    %c0_30 = arith.constant 0 : index
    %c0_31 = arith.constant 0 : index
    %53 = vector.load %arg4[%c2, %c0_30, %c0_31] : memref<8x32x32xf32, #tpu.memory_space<vmem>>, vector<1x32x32xf32>
    %54 = vector.shape_cast %53 : vector<1x32x32xf32> to vector<32x32xf32>
    %cst_32 = arith.constant dense<0.000000e+00> : vector<32x256xf32>
    %55 = tpu.matmul %54, %52, %cst_32 {dimension_numbers = #tpu.dot_dimension_numbers<[1], [0], [0], [1], [0, 0, 1, 1], [], []>} : vector<32x32xf32>, vector<32x256xf32>, vector<32x256xf32> -> vector<32x256xf32>
    %c2_33 = arith.constant 2 : index
    %c0_34 = arith.constant 0 : index
    %c0_35 = arith.constant 0 : index
    %56 = vector.load %arg5[%c2_33, %c0_34, %c0_35] : memref<8x32x1xf32, #tpu.memory_space<vmem>>, vector<1x32x1xf32>
    %57 = vector.shape_cast %56 : vector<1x32x1xf32> to vector<32x1xf32>
    %58 = vector.broadcast %57 : vector<32x1xf32> to vector<32x256xf32>
    %59 = arith.addf %55, %58 : vector<32x256xf32>
    %cst_36 = arith.constant 1.000000e+02 : f32
    %60 = vector.broadcast %cst_36 : f32 to vector<32x256xf32>
    %61 = arith.mulf %60, %59 : vector<32x256xf32>
    %cst_37 = arith.constant 2.000000e+01 : f32
    %62 = vector.broadcast %cst_37 : f32 to vector<32x256xf32>
    %63 = arith.minimumf %61, %62 : vector<32x256xf32>
    %cst_38 = arith.constant 2.000000e+01 : f32
    %64 = vector.broadcast %cst_38 : f32 to vector<32x256xf32>
    %65 = arith.cmpf ogt, %61, %64 : vector<32x256xf32>
    %66 = math.exp %63 : vector<32x256xf32>
    %67 = math.log1p %66 : vector<32x256xf32>
    %cst_39 = arith.constant 0.00999999977 : f32
    %68 = vector.broadcast %cst_39 : f32 to vector<32x256xf32>
    %69 = arith.mulf %67, %68 : vector<32x256xf32>
    %70 = arith.select %65, %59, %69 : vector<32x256xi1>, vector<32x256xf32>
    %c3 = arith.constant 3 : index
    %c0_40 = arith.constant 0 : index
    %c0_41 = arith.constant 0 : index
    %71 = vector.load %arg4[%c3, %c0_40, %c0_41] : memref<8x32x32xf32, #tpu.memory_space<vmem>>, vector<1x32x32xf32>
    %72 = vector.shape_cast %71 : vector<1x32x32xf32> to vector<32x32xf32>
    %cst_42 = arith.constant dense<0.000000e+00> : vector<32x256xf32>
    %73 = tpu.matmul %72, %70, %cst_42 {dimension_numbers = #tpu.dot_dimension_numbers<[1], [0], [0], [1], [0, 0, 1, 1], [], []>} : vector<32x32xf32>, vector<32x256xf32>, vector<32x256xf32> -> vector<32x256xf32>
    %c3_43 = arith.constant 3 : index
    %c0_44 = arith.constant 0 : index
    %c0_45 = arith.constant 0 : index
    %74 = vector.load %arg5[%c3_43, %c0_44, %c0_45] : memref<8x32x1xf32, #tpu.memory_space<vmem>>, vector<1x32x1xf32>
    %75 = vector.shape_cast %74 : vector<1x32x1xf32> to vector<32x1xf32>
    %76 = vector.broadcast %75 : vector<32x1xf32> to vector<32x256xf32>
    %77 = arith.addf %73, %76 : vector<32x256xf32>
    %cst_46 = arith.constant 1.000000e+02 : f32
    %78 = vector.broadcast %cst_46 : f32 to vector<32x256xf32>
    %79 = arith.mulf %78, %77 : vector<32x256xf32>
    %cst_47 = arith.constant 2.000000e+01 : f32
    %80 = vector.broadcast %cst_47 : f32 to vector<32x256xf32>
    %81 = arith.minimumf %79, %80 : vector<32x256xf32>
    %cst_48 = arith.constant 2.000000e+01 : f32
    %82 = vector.broadcast %cst_48 : f32 to vector<32x256xf32>
    %83 = arith.cmpf ogt, %79, %82 : vector<32x256xf32>
    %84 = math.exp %81 : vector<32x256xf32>
    %85 = math.log1p %84 : vector<32x256xf32>
    %cst_49 = arith.constant 0.00999999977 : f32
    %86 = vector.broadcast %cst_49 : f32 to vector<32x256xf32>
    %87 = arith.mulf %85, %86 : vector<32x256xf32>
    %88 = arith.select %83, %77, %87 : vector<32x256xi1>, vector<32x256xf32>
    %c4 = arith.constant 4 : index
    %c0_50 = arith.constant 0 : index
    %c0_51 = arith.constant 0 : index
    %89 = vector.load %arg4[%c4, %c0_50, %c0_51] : memref<8x32x32xf32, #tpu.memory_space<vmem>>, vector<1x32x32xf32>
    %90 = vector.shape_cast %89 : vector<1x32x32xf32> to vector<32x32xf32>
    %cst_52 = arith.constant dense<0.000000e+00> : vector<32x256xf32>
    %91 = tpu.matmul %90, %88, %cst_52 {dimension_numbers = #tpu.dot_dimension_numbers<[1], [0], [0], [1], [0, 0, 1, 1], [], []>} : vector<32x32xf32>, vector<32x256xf32>, vector<32x256xf32> -> vector<32x256xf32>
    %c4_53 = arith.constant 4 : index
    %c0_54 = arith.constant 0 : index
    %c0_55 = arith.constant 0 : index
    %92 = vector.load %arg5[%c4_53, %c0_54, %c0_55] : memref<8x32x1xf32, #tpu.memory_space<vmem>>, vector<1x32x1xf32>
    %93 = vector.shape_cast %92 : vector<1x32x1xf32> to vector<32x1xf32>
    %94 = vector.broadcast %93 : vector<32x1xf32> to vector<32x256xf32>
    %95 = arith.addf %91, %94 : vector<32x256xf32>
    %cst_56 = arith.constant 1.000000e+02 : f32
    %96 = vector.broadcast %cst_56 : f32 to vector<32x256xf32>
    %97 = arith.mulf %96, %95 : vector<32x256xf32>
    %cst_57 = arith.constant 2.000000e+01 : f32
    %98 = vector.broadcast %cst_57 : f32 to vector<32x256xf32>
    %99 = arith.minimumf %97, %98 : vector<32x256xf32>
    %cst_58 = arith.constant 2.000000e+01 : f32
    %100 = vector.broadcast %cst_58 : f32 to vector<32x256xf32>
    %101 = arith.cmpf ogt, %97, %100 : vector<32x256xf32>
    %102 = math.exp %99 : vector<32x256xf32>
    %103 = math.log1p %102 : vector<32x256xf32>
    %cst_59 = arith.constant 0.00999999977 : f32
    %104 = vector.broadcast %cst_59 : f32 to vector<32x256xf32>
    %105 = arith.mulf %103, %104 : vector<32x256xf32>
    %106 = arith.select %101, %95, %105 : vector<32x256xi1>, vector<32x256xf32>
    %c5 = arith.constant 5 : index
    %c0_60 = arith.constant 0 : index
    %c0_61 = arith.constant 0 : index
    %107 = vector.load %arg4[%c5, %c0_60, %c0_61] : memref<8x32x32xf32, #tpu.memory_space<vmem>>, vector<1x32x32xf32>
    %108 = vector.shape_cast %107 : vector<1x32x32xf32> to vector<32x32xf32>
    %cst_62 = arith.constant dense<0.000000e+00> : vector<32x256xf32>
    %109 = tpu.matmul %108, %106, %cst_62 {dimension_numbers = #tpu.dot_dimension_numbers<[1], [0], [0], [1], [0, 0, 1, 1], [], []>} : vector<32x32xf32>, vector<32x256xf32>, vector<32x256xf32> -> vector<32x256xf32>
    %c5_63 = arith.constant 5 : index
    %c0_64 = arith.constant 0 : index
    %c0_65 = arith.constant 0 : index
    %110 = vector.load %arg5[%c5_63, %c0_64, %c0_65] : memref<8x32x1xf32, #tpu.memory_space<vmem>>, vector<1x32x1xf32>
    %111 = vector.shape_cast %110 : vector<1x32x1xf32> to vector<32x1xf32>
    %112 = vector.broadcast %111 : vector<32x1xf32> to vector<32x256xf32>
    %113 = arith.addf %109, %112 : vector<32x256xf32>
    %cst_66 = arith.constant 1.000000e+02 : f32
    %114 = vector.broadcast %cst_66 : f32 to vector<32x256xf32>
    %115 = arith.mulf %114, %113 : vector<32x256xf32>
    %cst_67 = arith.constant 2.000000e+01 : f32
    %116 = vector.broadcast %cst_67 : f32 to vector<32x256xf32>
    %117 = arith.minimumf %115, %116 : vector<32x256xf32>
    %cst_68 = arith.constant 2.000000e+01 : f32
    %118 = vector.broadcast %cst_68 : f32 to vector<32x256xf32>
    %119 = arith.cmpf ogt, %115, %118 : vector<32x256xf32>
    %120 = math.exp %117 : vector<32x256xf32>
    %121 = math.log1p %120 : vector<32x256xf32>
    %cst_69 = arith.constant 0.00999999977 : f32
    %122 = vector.broadcast %cst_69 : f32 to vector<32x256xf32>
    %123 = arith.mulf %121, %122 : vector<32x256xf32>
    %124 = arith.select %119, %113, %123 : vector<32x256xi1>, vector<32x256xf32>
    %c6 = arith.constant 6 : index
    %c0_70 = arith.constant 0 : index
    %c0_71 = arith.constant 0 : index
    %125 = vector.load %arg4[%c6, %c0_70, %c0_71] : memref<8x32x32xf32, #tpu.memory_space<vmem>>, vector<1x32x32xf32>
    %126 = vector.shape_cast %125 : vector<1x32x32xf32> to vector<32x32xf32>
    %cst_72 = arith.constant dense<0.000000e+00> : vector<32x256xf32>
    %127 = tpu.matmul %126, %124, %cst_72 {dimension_numbers = #tpu.dot_dimension_numbers<[1], [0], [0], [1], [0, 0, 1, 1], [], []>} : vector<32x32xf32>, vector<32x256xf32>, vector<32x256xf32> -> vector<32x256xf32>
    %c6_73 = arith.constant 6 : index
    %c0_74 = arith.constant 0 : index
    %c0_75 = arith.constant 0 : index
    %128 = vector.load %arg5[%c6_73, %c0_74, %c0_75] : memref<8x32x1xf32, #tpu.memory_space<vmem>>, vector<1x32x1xf32>
    %129 = vector.shape_cast %128 : vector<1x32x1xf32> to vector<32x1xf32>
    %130 = vector.broadcast %129 : vector<32x1xf32> to vector<32x256xf32>
    %131 = arith.addf %127, %130 : vector<32x256xf32>
    %cst_76 = arith.constant 1.000000e+02 : f32
    %132 = vector.broadcast %cst_76 : f32 to vector<32x256xf32>
    %133 = arith.mulf %132, %131 : vector<32x256xf32>
    %cst_77 = arith.constant 2.000000e+01 : f32
    %134 = vector.broadcast %cst_77 : f32 to vector<32x256xf32>
    %135 = arith.minimumf %133, %134 : vector<32x256xf32>
    %cst_78 = arith.constant 2.000000e+01 : f32
    %136 = vector.broadcast %cst_78 : f32 to vector<32x256xf32>
    %137 = arith.cmpf ogt, %133, %136 : vector<32x256xf32>
    %138 = math.exp %135 : vector<32x256xf32>
    %139 = math.log1p %138 : vector<32x256xf32>
    %cst_79 = arith.constant 0.00999999977 : f32
    %140 = vector.broadcast %cst_79 : f32 to vector<32x256xf32>
    %141 = arith.mulf %139, %140 : vector<32x256xf32>
    %142 = arith.select %137, %131, %141 : vector<32x256xi1>, vector<32x256xf32>
    %c7 = arith.constant 7 : index
    %c0_80 = arith.constant 0 : index
    %c0_81 = arith.constant 0 : index
    %143 = vector.load %arg4[%c7, %c0_80, %c0_81] : memref<8x32x32xf32, #tpu.memory_space<vmem>>, vector<1x32x32xf32>
    %144 = vector.shape_cast %143 : vector<1x32x32xf32> to vector<32x32xf32>
    %cst_82 = arith.constant dense<0.000000e+00> : vector<32x256xf32>
    %145 = tpu.matmul %144, %142, %cst_82 {dimension_numbers = #tpu.dot_dimension_numbers<[1], [0], [0], [1], [0, 0, 1, 1], [], []>} : vector<32x32xf32>, vector<32x256xf32>, vector<32x256xf32> -> vector<32x256xf32>
    %c7_83 = arith.constant 7 : index
    %c0_84 = arith.constant 0 : index
    %c0_85 = arith.constant 0 : index
    %146 = vector.load %arg5[%c7_83, %c0_84, %c0_85] : memref<8x32x1xf32, #tpu.memory_space<vmem>>, vector<1x32x1xf32>
    %147 = vector.shape_cast %146 : vector<1x32x1xf32> to vector<32x1xf32>
    %148 = vector.broadcast %147 : vector<32x1xf32> to vector<32x256xf32>
    %149 = arith.addf %145, %148 : vector<32x256xf32>
    %cst_86 = arith.constant 1.000000e+02 : f32
    %150 = vector.broadcast %cst_86 : f32 to vector<32x256xf32>
    %151 = arith.mulf %150, %149 : vector<32x256xf32>
    %cst_87 = arith.constant 2.000000e+01 : f32
    %152 = vector.broadcast %cst_87 : f32 to vector<32x256xf32>
    %153 = arith.minimumf %151, %152 : vector<32x256xf32>
    %cst_88 = arith.constant 2.000000e+01 : f32
    %154 = vector.broadcast %cst_88 : f32 to vector<32x256xf32>
    %155 = arith.cmpf ogt, %151, %154 : vector<32x256xf32>
    %156 = math.exp %153 : vector<32x256xf32>
    %157 = math.log1p %156 : vector<32x256xf32>
    %cst_89 = arith.constant 0.00999999977 : f32
    %158 = vector.broadcast %cst_89 : f32 to vector<32x256xf32>
    %159 = arith.mulf %157, %158 : vector<32x256xf32>
    %160 = arith.select %155, %149, %159 : vector<32x256xi1>, vector<32x256xf32>
    %c0_90 = arith.constant 0 : index
    %c0_91 = arith.constant 0 : index
    %161 = vector.load %arg6[%c0_90, %c0_91] : memref<1x32xf32, #tpu.memory_space<vmem>>, vector<1x32xf32>
    %cst_92 = arith.constant dense<0.000000e+00> : vector<1x256xf32>
    %162 = tpu.matmul %161, %160, %cst_92 {dimension_numbers = #tpu.dot_dimension_numbers<[1], [0], [0], [1], [0, 0, 1, 1], [], []>} : vector<1x32xf32>, vector<32x256xf32>, vector<1x256xf32> -> vector<1x256xf32>
    %c0_93 = arith.constant 0 : index
    %c0_94 = arith.constant 0 : index
    %163 = vector.load %arg7[%c0_93, %c0_94] : memref<1x1xf32, #tpu.memory_space<vmem>>, vector<1x1xf32>
    %164 = vector.broadcast %163 : vector<1x1xf32> to vector<1x256xf32>
    %165 = arith.addf %162, %164 : vector<1x256xf32>
    %c0_95 = arith.constant 0 : index
    %c0_96 = arith.constant 0 : index
    %166 = vector.load %arg8[%c0_95, %c0_96] : memref<1x256xf32, #tpu.memory_space<vmem>>, vector<1x256xf32>
    tpu.vector_store %arg8[%c0_95, %c0_96], %165 {strides = array<i32>} : memref<1x256xf32, #tpu.memory_space<vmem>>, vector<1x256xf32>,
    return
  }
  func.func @transform_0(%arg0: i32) -> (i32, i32) {
    %c0_i32 = arith.constant 0 : i32
    %c0_i32_0 = arith.constant 0 : i32
    return %c0_i32, %arg0 : i32, i32
  }
  func.func @transform_1(%arg0: i32) -> (i32, i32) {
    %c0_i32 = arith.constant 0 : i32
    %c0_i32_0 = arith.constant 0 : i32
    %c0_i32_1 = arith.constant 0 : i32
    return %c0_i32, %c0_i32_0 : i32, i32
  }
  func.func @transform_2(%arg0: i32) -> (i32, i32) {
    %c0_i32 = arith.constant 0 : i32
    %c0_i32_0 = arith.constant 0 : i32
    %c0_i32_1 = arith.constant 0 : i32
    return %c0_i32, %c0_i32_0 : i32, i32
  }
  func.func @transform_3(%arg0: i32) -> (i32, i32, i32) {
    %c0_i32 = arith.constant 0 : i32
    %c0_i32_0 = arith.constant 0 : i32
    %c0_i32_1 = arith.constant 0 : i32
    %c0_i32_2 = arith.constant 0 : i32
    return %c0_i32, %c0_i32_0, %c0_i32_1 : i32, i32, i32
  }
  func.func @transform_4(%arg0: i32) -> (i32, i32, i32) {
    %c0_i32 = arith.constant 0 : i32
    %c0_i32_0 = arith.constant 0 : i32
    %c0_i32_1 = arith.constant 0 : i32
    %c0_i32_2 = arith.constant 0 : i32
    return %c0_i32, %c0_i32_0, %c0_i32_1 : i32, i32, i32
  }
  func.func @transform_5(%arg0: i32) -> (i32, i32) {
    %c0_i32 = arith.constant 0 : i32
    %c0_i32_0 = arith.constant 0 : i32
    %c0_i32_1 = arith.constant 0 : i32
    return %c0_i32, %c0_i32_0 : i32, i32
  }
  func.func @transform_6(%arg0: i32) -> (i32, i32) {
    %c0_i32 = arith.constant 0 : i32
    %c0_i32_0 = arith.constant 0 : i32
    %c0_i32_1 = arith.constant 0 : i32
    return %c0_i32, %c0_i32_0 : i32, i32
  }
  func.func @transform_7(%arg0: i32) -> (i32, i32) {
    %c0_i32 = arith.constant 0 : i32
    %c0_i32_0 = arith.constant 0 : i32
    return %c0_i32, %arg0 : i32, i32
  }
}

</mosaic_0001>

<bundles_post_ra>
// kernel: tpu_custom_call.1
= control target key start
LH: loop header
LB: loop body
LE: loop exit
PB: predicated region body
PF: predicated region fallthrough
CT: control target
= control target key end

     0   :  { %s4921_s0 = inlined_call_operand.vmem [shape: f32[3,1024], index: 0, kind: input, shape index: {}]   ;;  %s4922_s1 = inlined_call_operand.vmem [shape: f32[32,3], index: 1, kind: input, shape index: {}]   ;;  %s4923_s2 = inlined_call_operand.vmem [shape: f32[32,1], index: 2, kind: input, shape index: {}]   ;;  %s4924_s3 = inlined_call_operand.vmem [shape: f32[8,32,32], index: 3, kind: input, shape index: {}]   ;;  %s4925_s4 = inlined_call_operand.vmem [shape: f32[8,32,1], index: 4, kind: input, shape index: {}]   ;;  %s4926_s5 = inlined_call_operand.vmem [shape: f32[1,32], index: 5, kind: input, shape index: {}]   ;;  %s4927_s6 = inlined_call_operand.<no memory space> [shape: f32[1,1], index: 6, kind: input, shape index: {}]   ;;  %s4928_s7 = inlined_call_operand.hbm [shape: f32[1,1024], index: 7, kind: output, shape index: {}]  }
   0x1   :  { %v12_v0 = vstv %s4927_s6 }
   0x2   :  { %13 = vst [vmem:[#allocation2] sm:$0x1] %v12_v0 }
   0x3   :  { %14 = vsyncpa [#allocation4], 0 }
   0x4   :  { %16 = vsyncpa [#allocation4 + $0x1], 0  ;;  %s3427_s26 = smov 0   ;;  %s3429_s27 = smov 0  }
   0x5   :  { %s3431_s28 = smov 0   ;;  %s3433_s29 = smov 0  }
   0x6 LB: > { %s3448_s6 = sadd.s32 4294967295, %s3378_s29   ;;  %s2801_s30 = sadd.s32 4294967294, %s3378_s29   ;;  %s3378_s29 = sphi %s3433_s29, %s5030_s29   ;;  %s3374_s28 = sphi %s3431_s28, %s5029_s28   ;;  %s3370_s27 = sphi %s3429_s27, %s5028_s27   ;;  %s3366_s26 = sphi %s3427_s26, %s5027_s26  }
   0x7   : > { %s3452_s8 = sadd.s32 1, %s3378_s29   ;;  %s181_s9 = sadd.s32 1, %s3374_s28 }
   0x8   : > { %s178_s10 = ssub.s32 %s3378_s29, %s3452_s8  ;;  %p191_p0 = scmp.ne.s32.totalorder %s3374_s28, %s3370_s27 }
   0x9   : > { %p179_p1 = scmp.eq.s32.totalorder %s178_s10, 0  ;;  %p192_p2 = scmp.eq.s32.totalorder %s3448_s6, 3 }
   0xa   : > { %p197_p3 = scmp.ne.s32.totalorder %s3370_s27, %s3366_s26  ;;  %p198_p4 = scmp.eq.s32.totalorder %s2801_s30, 3 }
   0xb   : > { %s3463_s11 = scalar_select %p179_p1, %s3374_s28, %s181_s9  }
   0xc   : > { %p3465_p5 = por %p192_p2, %p191_p0  ;;  %p3469_p6 = por %p198_p4, %p197_p3 }
   0xd   : > { %p2804_p7 = scmp.ge.s32.totalorder %s3378_s29, 1  ;;  %p243_p8 = scmp.lt.s32.totalorder %s3378_s29, 5 }
   0xf   : > { %p244_p9 = pnand %p2804_p7, %p243_p8 }
  0x10   : > { %s2806_s14 = sshll.u32 (!%p244_p9), %s3448_s6, 1  ;;  %v3380_v1 = vmov (!%p244_p9), 0.0   ;;  %v287_v2 = vld [vmem:[%s4923_s2] sm:$0xff] (!%p244_p9)  ;;  %v3381_v3 = vmov (!%p244_p9), 0   ;;  %v289_v4 = vld [vmem:[%s4923_s2 + $0x10] sm:$0xff] (!%p244_p9)  ;;  %v288_v5 = vld [vmem:[%s4923_s2 + $0x8] sm:$0xff] (!%p244_p9) }
  0x11   : > { %247 = sbr.rel (%p244_p9) target bundleno = 2693 (0xa85), region = 48  ;;  %p276_p10 = scmp.lt.s32.totalorder (!%p244_p9), %s2806_s14, 7  ;;  %395 = vmatprep.mubr.f32.mxu0 (!%p244_p9), %v3380_v1  ;;  %407 = vmatprep.mubr.f32.mxu1 (!%p244_p9), %v3380_v1  ;;  %v290_v6 = vld [vmem:[%s4923_s2 + $0x18] sm:$0xff] (!%p244_p9)  ;;  %vm326_vm0 = vcmask (!%p244_p9), 1042432   ;;  %v283_v9 = vld [vmem:[%s4922_s1] sm:$0xff] (!%p244_p9)  ;;  %vm313_vm1 = vcmask (!%p244_p9), 23552  }
  0x12   : > { %3025 = vset.pattern.permute.xlu0 (!%p244_p9), %v3381_v3  ;;  %3026 = vset.pattern.permute.xlu1 (!%p244_p9), %v3381_v3  ;;  %v285_v10 = vld [vmem:[%s4922_s1 + $0x10] sm:$0xff] (!%p244_p9)  ;;  %v552_v11 = vld [vmem:[%s4925_s4] sm:$0xff] (!%p244_p9)  ;;  %v553_v12 = vld [vmem:[%s4925_s4 + $0x8] sm:$0xff] (!%p244_p9)  ;;  %s272_s16 = sand.u32 (!%p244_p9), 1, %s3370_s27   ;;  %s2908_s17 = sshll.u32 (!%p244_p9), %s3448_s6, 5 }
  0x13   : > { %293 = vperm.xlu0 (!%p244_p9), %3025, %v287_v2   ;;  %303 = vperm.xlu1 (!%p244_p9), %3026, %v289_v4   ;;  %v284_v13 = vld [vmem:[%s4922_s1 + $0x8] sm:$0xff] (!%p244_p9)  ;;  %v286_v14 = vld [vmem:[%s4922_s1 + $0x18] sm:$0xff] (!%p244_p9)  ;;  %v554_v15 = vld [vmem:[%s4925_s4 + $0x10] sm:$0xff] (!%p244_p9)  ;;  %s4879_s22 = scalar_lea.hbm (!%p244_p9), %s4928_s7, %s2908_s17  ;;  %s3383_s6 = smov (!%p244_p9), [#allocation3]  }
  0x14   : > { %v555_v16 = vld [vmem:[%s4925_s4 + $0x18] sm:$0xff] (!%p244_p9)  ;;  %v2822_v17 = vld [vmem:[%s4925_s4 + $0x20] sm:$0xff] (!%p244_p9)  ;;  %v2823_v18 = vld [vmem:[%s4925_s4 + $0x28] sm:$0xff] (!%p244_p9)  ;;  %s3320_s25 = sshll.u32 (!%p244_p9), %s3383_s6, 4  ;;  %s3321_s25 = int_to_ptr.vmem [resolvable:$false] %s3320_s25 }
  0x15   : > { %v2824_v19 = vld [vmem:[%s4925_s4 + $0x30] sm:$0xff] (!%p244_p9)  ;;  %v2825_v20 = vld [vmem:[%s4925_s4 + $0x38] sm:$0xff] (!%p244_p9)  ;;  %v2834_v21 = vld [vmem:[%s4925_s4 + $0x40] sm:$0xff] (!%p244_p9) }
  0x16   : > { %v2835_v22 = vld [vmem:[%s4925_s4 + $0x48] sm:$0xff] (!%p244_p9)  ;;  %v2836_v23 = vld [vmem:[%s4925_s4 + $0x50] sm:$0xff] (!%p244_p9)  ;;  %v2837_v24 = vld [vmem:[%s4925_s4 + $0x58] sm:$0xff] (!%p244_p9) }
  0x17   : > { %298 = vperm.xlu0 (!%p244_p9), %3025, %v288_v5   ;;  %308 = vperm.xlu1 (!%p244_p9), %3026, %v290_v6   ;;  %v2846_v25 = vld [vmem:[%s4925_s4 + $0x60] sm:$0xff] (!%p244_p9)  ;;  %v2847_v26 = vld [vmem:[%s4925_s4 + $0x68] sm:$0xff] (!%p244_p9)  ;;  %v2848_v27 = vld [vmem:[%s4925_s4 + $0x70] sm:$0xff] (!%p244_p9) }
  0x18   : > { %s5032_s14 = smov (!%p276_p10, %s2806_s14), 7  ;;  %v2849_v28 = vld [vmem:[%s4925_s4 + $0x78] sm:$0xff]  ;;  %v2858_v29 = vld [vmem:[%s4925_s4 + $0x80] sm:$0xff]  ;;  %v2859_v30 = vld [vmem:[%s4925_s4 + $0x88] sm:$0xff] }
  0x19   : > { %s2807_s23 = sshll.u32 %s5032_s14, 2  ;;  %v2860_v31 = vld [vmem:[%s4925_s4 + $0x90] sm:$0xff]  ;;  %v2861_v32 = vld [vmem:[%s4925_s4 + $0x98] sm:$0xff]  ;;  %v2870_v33 = vld [vmem:[%s4925_s4 + $0xa0] sm:$0xff]  ;;  %s2805_s14 = sshll.u32 %s272_s16, 1 }
  0x1a   : > { %s279_s30 = scalar_lea.vmem %s4921_s0, %s2807_s23  ;;  %v2871_v34 = vld [vmem:[%s4925_s4 + $0xa8] sm:$0xff]  ;;  %v2872_v35 = vld [vmem:[%s4925_s4 + $0xb0] sm:$0xff]  ;;  %v2873_v36 = vld [vmem:[%s4925_s4 + $0xb8] sm:$0xff]  ;;  %s274_s18 = scalar_lea.vmem [#allocation3], %s2805_s14 }
  0x1b   : > { %v282_v7 = vld [vmem:[%s279_s30] sm:$0x77]  ;;  %558 = vperm.xlu0 %3025, %v552_v11   ;;  %563 = vperm.xlu1 %3026, %v553_v12   ;;  %v2883_v38 = vld [vmem:[%s4925_s4 + $0xc8] sm:$0xff]  ;;  %v2884_v39 = vld [vmem:[%s4925_s4 + $0xd0] sm:$0xff]  ;;  %s2742_s19 = sshll.u32 %s274_s18, 4  ;;  %s2728_s23 = scalar_lea.sflag [#allocation4], %s272_s16  ;;  %s4881_s19 = int_to_ptr.vmem [resolvable:$true] %s2742_s19 }
  0x1c   : > { %v312_v8 = vcombine.high %v282_v7, %v282_v7  ;;  %v2882_v37 = vld [vmem:[%s4925_s4 + $0xc0] sm:$0xff]  ;;  %v2885_v40 = vld [vmem:[%s4925_s4 + $0xd8] sm:$0xff]  ;;  %v2895_v42 = vld [vmem:[%s4925_s4 + $0xe8] sm:$0xff]  ;;  %s3316_s24 = scalar_lea.vmem %s4881_s19, 32  ;;  %s3322_s30 = scalar_lea.vmem %s3321_s25, 64 }
  0x1d   : > { %v2894_v41 = vld [vmem:[%s4925_s4 + $0xe0] sm:$0xff]  ;;  %v2896_v43 = vld [vmem:[%s4925_s4 + $0xf0] sm:$0xff]  ;;  %v2897_v44 = vld [vmem:[%s4925_s4 + $0xf8] sm:$0xff]  ;;  %p3317_p11 = scmp.ne.s32.totalorder %s4881_s19, %s3316_s24  ;;  %p3323_p0 = scmp.lt.s32.totalorder %s4881_s19, %s3321_s25 }
  0x1e   : > { %2808 = vmatprep.subr.msk.mxu0 %vm326_vm0, %v312_v8  ;;  %2981 = vmatprep.subr.msk.mxu1 %vm326_vm0, %v312_v8  ;;  %v2620_v45 = vld [vmem:[#allocation2] sm:$0x1]  ;;  %p3324_p1 = scmp.lt.s32.totalorder %s3322_s30, %s3316_s24 }
  0x1f   : > { %2809 = vmatpush1.msk.msra.mxu0 %vm326_vm0, %v282_v7  ;;  %2982 = vmatpush1.msk.msra.mxu1 %vm326_vm0, %v282_v7  ;;  %p3318_p12 = pnand %p3317_p11, %p3465_p5 }
  0x20   : > { %2810 = vmatmul.mubr.msk.f32.vlgmr.msra.gmra.mrb[0].mxu0 %vm313_vm1, %v283_v9  ;;  %2812 = vmatmul.mubr.msk.f32.vlgmr.msra.gmra.mrb[0].mxu1 %vm313_vm1, %v285_v10  ;;  %p3325_p2 = por %p3324_p1, %p3323_p0 }
  0x21   : > { %401 = vmatprep.mubr.f32.mxu0 %v3380_v1  ;;  %413 = vmatprep.mubr.f32.mxu1 %v3380_v1  ;;  %p3319_p13 = pneg %p3318_p12 }
  0x22   : > { %568 = vperm.xlu0 %3025, %v554_v15   ;;  %573 = vperm.xlu1 %3026, %v555_v16  }
  0x23   : > { %p3326_p3 = pnand %p3325_p2, %p3319_p13 }
  0x24   : > { %2811 = vmatmul.mubr.msk.f32.gmra.mrb[2].mxu0 %vm313_vm1, %v284_v13  ;;  %2813 = vmatmul.mubr.msk.f32.gmra.mrb[2].mxu1 %vm313_vm1, %v286_v14 }
  0x25   : > { %653 = vmatprep.mubr.f32.mxu1 %v3380_v1  ;;  %912 = vmatprep.mubr.f32.mxu0 %v3380_v1 }
  0x26   : > { %818 = vperm.xlu0 %3025, %v2822_v17   ;;  %823 = vperm.xlu1 %3026, %v2823_v18  }
  0x2a   : > { %828 = vperm.xlu0 %3025, %v2824_v19   ;;  %833 = vperm.xlu1 %3026, %v2825_v20  }
  0x2e   : > { %1077 = vperm.xlu0 %3025, %v2834_v21   ;;  %1082 = vperm.xlu1 %3026, %v2835_v22  }
  0x32   : > { %1087 = vperm.xlu0 %3025, %v2836_v23   ;;  %1092 = vperm.xlu1 %3026, %v2837_v24  }
  0x36   : > { %1336 = vperm.xlu0 %3025, %v2846_v25   ;;  %1341 = vperm.xlu1 %3026, %v2847_v26  }
  0x3a   : > { %1346 = vperm.xlu0 %3025, %v2848_v27   ;;  %1351 = vperm.xlu1 %3026, %v2849_v28  }
  0x3e   : > { %1595 = vperm.xlu0 %3025, %v2858_v29   ;;  %1600 = vperm.xlu1 %3026, %v2859_v30  }
  0x42   : > { %1605 = vperm.xlu0 %3025, %v2860_v31   ;;  %1610 = vperm.xlu1 %3026, %v2861_v32  }
  0x46   : > { %1854 = vperm.xlu0 %3025, %v2870_v33   ;;  %1859 = vperm.xlu1 %3026, %v2871_v34  }
  0x4a   : > { %1864 = vperm.xlu0 %3025, %v2872_v35   ;;  %1869 = vperm.xlu1 %3026, %v2873_v36  }
  0x4e   : > { %2113 = vperm.xlu0 %3025, %v2882_v37   ;;  %2118 = vperm.xlu1 %3026, %v2883_v38  }
  0x52   : > { %2123 = vperm.xlu0 %3025, %v2884_v39   ;;  %2128 = vperm.xlu1 %3026, %v2885_v40  }
  0x56   : > { %2372 = vperm.xlu0 %3025, %v2894_v41   ;;  %2377 = vperm.xlu1 %3026, %v2895_v42  }
  0x5a   : > { %2382 = vperm.xlu0 %3025, %v2896_v43   ;;  %2387 = vperm.xlu1 %3026, %v2897_v44  }
  0x5e   : > { %2623 = vperm.xlu0 %3025, %v2620_v45  }
  0x92   : > { %v294_v46 = vpop.permute.xlu0 %293  ;;  %v304_v47 = vpop.permute.xlu1 %303 }
  0x96   : > { %v299_v3 = vpop.permute.xlu0 %298  ;;  %v309_v4 = vpop.permute.xlu1 %308 }
  0xf3   : > { %v397_v48 = vpop.f32.mrb[0].mxu0  ;;  %v409_v49 = vpop.f32.mrb[0].mxu1 }
  0xf4   : > { %v3609_v50 = vadd.f32 %v397_v48, %v294_v46  ;;  %v3611_v51 = vadd.f32 %v409_v49, %v304_v47  ;;  %v399_v52 = vpop.f32.mrb[1].mxu0  ;;  %v411_v53 = vpop.f32.mrb[1].mxu1 }
  0xf5   : > { %v3613_v54 = vadd.f32 %v399_v52, %v294_v46  ;;  %v3615_v55 = vadd.f32 %v411_v53, %v304_v47 }
  0xf6   : > { %v3618_v56 = vmul.f32 100.0, %v3609_v50  ;;  %v3621_v57 = vmul.f32 100.0, %v3611_v51 }
  0xf7   : > { %v3624_v58 = vmul.f32 100.0, %v3613_v54  ;;  %v3627_v59 = vmul.f32 100.0, %v3615_v55  ;;  %v403_v60 = vpop.f32.mrb[2].mxu0  ;;  %v415_v61 = vpop.f32.mrb[2].mxu1 }
  0xf8   : > { %v428_v62 = vmin.f32 %v3618_v56, 20.0  ;;  %v432_v63 = vmin.f32 %v3621_v57, 20.0  ;;  %v405_v0 = vpop.f32.mrb[3].mxu0  ;;  %v417_v2 = vpop.f32.mrb[3].mxu1  ;;  %v3633_v9 = vadd.f32 %v403_v60, %v299_v3  ;;  %v3635_v10 = vadd.f32 %v415_v61, %v309_v4 }
  0xf9   : > { %v429_v5 = vmin.f32 %v3624_v58, 20.0  ;;  %v433_v6 = vmin.f32 %v3627_v59, 20.0  ;;  %v3637_v12 = vadd.f32 %v405_v0, %v299_v3  ;;  %v3639_v13 = vadd.f32 %v417_v2, %v309_v4 }
  0xfa   : > { %v444_v7 = vmul.f32 1.442695, %v428_v62  ;;  %v452_v8 = vmul.f32 1.442695, %v432_v63  ;;  %v3642_v14 = vmul.f32 100.0, %v3633_v9  ;;  %v3645_v15 = vmul.f32 100.0, %v3635_v10 }
  0xfb   : > { %v446_v11 = vmul.f32 1.442695, %v429_v5  ;;  %v454_v16 = vmul.f32 1.442695, %v433_v6  ;;  %v3648_v17 = vmul.f32 100.0, %v3637_v12  ;;  %v3651_v18 = vmul.f32 100.0, %v3639_v13 }
  0xfc   : > { %3028 = vpow2.f32 %v444_v7  ;;  %v430_v19 = vmin.f32 %v3642_v14, 20.0  ;;  %v434_v20 = vmin.f32 %v3645_v15, 20.0  ;;  %vm436_vm4 = vcmp.gt.f32.partialorder %v3618_v56, 20.0 }
  0xfd   : > { %3030 = vpow2.f32 %v452_v8  ;;  %v431_v21 = vmin.f32 %v3648_v17, 20.0  ;;  %v435_v24 = vmin.f32 %v3651_v18, 20.0  ;;  %vm438_vm5 = vcmp.gt.f32.partialorder %v3642_v14, 20.0 }
  0xfe   : > { %3032 = vpow2.f32 %v446_v11  ;;  %v448_v22 = vmul.f32 1.442695, %v430_v19  ;;  %v456_v23 = vmul.f32 1.442695, %v434_v20  ;;  %vm440_vm6 = vcmp.gt.f32.partialorder %v3621_v57, 20.0 }
  0xff   : > { %3034 = vpow2.f32 %v454_v16  ;;  %v450_v25 = vmul.f32 1.442695, %v431_v21  ;;  %v458_v26 = vmul.f32 1.442695, %v435_v24  ;;  %vm442_vm7 = vcmp.gt.f32.partialorder %v3645_v15, 20.0  ;;  %v559_v15 = vpop.permute.xlu0 %558 }
 0x100   : > { %3036 = vpow2.f32 %v448_v22  ;;  %vm437_vm9 = vcmp.gt.f32.partialorder %v3624_v58, 20.0  ;;  %vm439_vm12 = vcmp.gt.f32.partialorder %v3648_v17, 20.0  ;;  %vm441_vm0 = vcmp.gt.f32.partialorder %v3627_v59, 20.0  ;;  %v549_v59 = vld [vmem:[%s4924_s3 + $0x8] sm:$0xff] }
 0x101   : > { %3038 = vpow2.f32 %v456_v23  ;;  %vm443_vm1 = vcmp.gt.f32.partialorder %v3651_v18, 20.0 }
 0x102   : > { %3040 = vpow2.f32 %v450_v25 }
 0x103   : > { %3042 = vpow2.f32 %v458_v26 }
 0x106   : > { %v3029_v27 = vpop.eup %3028 }
 0x107   : > { %v3031_v28 = vpop.eup %3030  ;;  %v460_v29 = vadd.f32 1.0, %v3029_v27  ;;  %v463_v35 = vmul.f32 -0.5, %v3029_v27  ;;  %v466_v36 = vand.u32 2147483647, %v3029_v27 }
 0x108   : > { %v3033_v30 = vpop.eup %3032  ;;  %v496_v31 = vadd.f32 1.0, %v3031_v28  ;;  %v499_v38 = vmul.f32 -0.5, %v3031_v28  ;;  %v502_v41 = vand.u32 2147483647, %v3031_v28 }
 0x109   : > { %3044 = vlog2.f32 %v460_v29  ;;  %v469_v32 = vadd.f32 1.0, %v3033_v30  ;;  %v3657_v33 = vpop.eup %3034  ;;  %v472_v43 = vmul.f32 -0.5, %v3033_v30  ;;  %v464_v47 = vadd.f32 1.0, %v463_v35 }
 0x10a   : > { %3046 = vlog2.f32 %v496_v31  ;;  %v3037_v34 = vpop.eup %3036  ;;  %v505_v44 = vadd.f32 1.0, %v3657_v33  ;;  %vm3665_vm2 = vcmp.lt.f32.partialorder %v466_v36, 0.0004427343  ;;  %v500_v49 = vadd.f32 1.0, %v499_v38 }
 0x10b   : > { %3048 = vlog2.f32 %v469_v32  ;;  %v3039_v37 = vpop.eup %3038  ;;  %v478_v39 = vadd.f32 1.0, %v3037_v34  ;;  %v481_v52 = vmul.f32 -0.5, %v3037_v34  ;;  %vm3669_vm3 = vcmp.lt.f32.partialorder %v502_v41, 0.0004427343  ;;  %v569_v41 = vpop.permute.xlu0 %568 }
 0x10c   : > { %v3659_v40 = vpop.eup %3040  ;;  %v514_v42 = vadd.f32 1.0, %v3039_v37  ;;  %v517_v53 = vmul.f32 -0.5, %v3039_v37  ;;  %v473_v61 = vadd.f32 1.0, %v472_v43  ;;  %v475_v62 = vand.u32 2147483647, %v3033_v30 }
 0x10d   : > { %3050 = vlog2.f32 %v478_v39  ;;  %v487_v45 = vadd.f32 1.0, %v3659_v40  ;;  %v3663_v46 = vpop.eup %3042  ;;  %v484_v0 = vand.u32 2147483647, %v3037_v34  ;;  %v508_v2 = vmul.f32 -0.5, %v3657_v33 }
 0x10e   : > { %3052 = vlog2.f32 %v514_v42  ;;  %v511_v3 = vand.u32 2147483647, %v3657_v33  ;;  %v523_v4 = vadd.f32 1.0, %v3663_v46  ;;  %v520_v7 = vand.u32 2147483647, %v3039_v37 }
 0x10f   : > { %3054 = vlog2.f32 %v487_v45  ;;  %v490_v8 = vmul.f32 -0.5, %v3659_v40  ;;  %v482_v19 = vadd.f32 1.0, %v481_v52  ;;  %v518_v20 = vadd.f32 1.0, %v517_v53 }
 0x110   : > { %3056 = vlog2.f32 %v505_v44  ;;  %v465_v21 = vmul.f32 %v3029_v27, %v464_v47  ;;  %v501_v22 = vmul.f32 %v3031_v28, %v500_v49  ;;  %v526_v24 = vmul.f32 -0.5, %v3663_v46 }
 0x111   : > { %3058 = vlog2.f32 %v523_v4  ;;  %v474_v25 = vmul.f32 %v3033_v30, %v473_v61  ;;  %vm3682_vm8 = vcmp.lt.f32.partialorder %v475_v62, 0.0004427343  ;;  %v493_v29 = vand.u32 2147483647, %v3659_v40 }
 0x112   : > { %v509_v31 = vadd.f32 1.0, %v508_v2  ;;  %vm3690_vm10 = vcmp.lt.f32.partialorder %v484_v0, 0.0004427343  ;;  %vm3694_vm11 = vcmp.lt.f32.partialorder %v520_v7, 0.0004427343  ;;  %v491_v30 = vadd.f32 1.0, %v490_v8 }
 0x113   : > { %v3045_v63 = vpop.eup %3044  ;;  %v483_v38 = vmul.f32 %v3037_v34, %v482_v19  ;;  %v519_v39 = vmul.f32 %v3039_v37, %v518_v20  ;;  %vm3701_vm13 = vcmp.lt.f32.partialorder %v511_v3, 0.0004427343  ;;  %v527_v45 = vadd.f32 1.0, %v526_v24 }
 0x114   : > { %v3047_v5 = vpop.eup %3046  ;;  %v462_v6 = vmul.f32 0.6931472, %v3045_v63  ;;  %v529_v47 = vand.u32 2147483647, %v3663_v46  ;;  %vm3708_vm14 = vcmp.lt.f32.partialorder %v493_v29, 0.0004427343  ;;  %v510_v34 = vmul.f32 %v3657_v33, %v509_v31  ;;  %v564_v29 = vpop.permute.xlu1 %563 }
 0x115   : > { %v3049_v11 = vpop.eup %3048  ;;  %v498_v16 = vmul.f32 0.6931472, %v3047_v5  ;;  %v492_v63 = vmul.f32 %v3659_v40, %v491_v30  ;;  %v528_v33 = vmul.f32 %v3663_v46, %v527_v45 }
 0x116   : > { %v471_v23 = vmul.f32 0.6931472, %v3049_v11  ;;  %v468_v27 = vsel %vm3665_vm2, %v465_v21, %v462_v6  ;;  %vm3721_vm15 = vcmp.lt.f32.partialorder %v529_v47, 0.0004427343  ;;  %vm576_vm2 = vcmask 261120  }
 0x117   : > { %v3051_v35 = vpop.eup %3050  ;;  %v504_v36 = vsel %vm3669_vm3, %v501_v22, %v498_v16  ;;  %v532_v49 = vmul.f32 0.01, %v468_v27 }
 0x118   : > { %v3053_v42 = vpop.eup %3052  ;;  %v480_v43 = vmul.f32 0.6931472, %v3051_v35  ;;  %v477_v44 = vsel %vm3682_vm8, %v474_v25, %v471_v23  ;;  %v536_v60 = vmul.f32 0.01, %v504_v36 }
 0x119   : > { %v3055_v48 = vpop.eup %3054  ;;  %v516_v52 = vmul.f32 0.6931472, %v3053_v42  ;;  %v533_v3 = vmul.f32 0.01, %v477_v44  ;;  %v540_v40 = vsel %vm436_vm4, %v3609_v50, %v532_v49 }
 0x11a   : > { %v3057_v37 = vpop.eup %3056  ;;  %v486_v61 = vsel %vm3690_vm10, %v483_v38, %v480_v43  ;;  %v489_v62 = vmul.f32 0.6931472, %v3055_v48  ;;  %v544_v46 = vsel %vm440_vm6, %v3611_v51, %v536_v60 }
 0x11b   : > { %v534_v0 = vmul.f32 0.01, %v486_v61  ;;  %v522_v2 = vsel %vm3694_vm11, %v519_v39, %v516_v52  ;;  %v507_v4 = vmul.f32 0.6931472, %v3057_v37  ;;  %v3059_v8 = vpop.eup %3058  ;;  %v541_v50 = vsel %vm437_vm9, %v3613_v54, %v533_v3  ;;  %v574_v37 = vpop.permute.xlu1 %573 }
 0x11c   : > { %v538_v5 = vmul.f32 0.01, %v522_v2  ;;  %v495_v6 = vsel %vm3708_vm14, %v492_v63, %v489_v62  ;;  %v525_v22 = vmul.f32 0.6931472, %v3059_v8 }
 0x11d   : > { %v542_v11 = vsel %vm438_vm5, %v3633_v9, %v534_v0  ;;  %v535_v16 = vmul.f32 0.01, %v495_v6  ;;  %v513_v19 = vsel %vm3701_vm13, %v510_v34, %v507_v4 }
 0x11e   : > { %v2911_v20 = vpack.c.bf16 %v542_v11, %v540_v40  ;;  %v546_v21 = vsel %vm442_vm7, %v3635_v10, %v538_v5  ;;  %v537_v14 = vmul.f32 0.01, %v513_v19  ;;  %v531_v51 = vsel %vm3721_vm15, %v528_v33, %v525_v22 }
 0x11f   : > { %v2915_v56 = vpack.c.bf16 %v546_v21, %v544_v46  ;;  %v543_v9 = vsel %vm439_vm12, %v3637_v12, %v535_v16  ;;  %v539_v57 = vmul.f32 0.01, %v531_v51  ;;  %v548_v12 = vld [vmem:[%s4924_s3] sm:$0xff] }
 0x120   : > { %v2909_v23 = vpack.c.bf16 %v543_v9, %v541_v50  ;;  %v545_v10 = vsel %vm441_vm0, %v3615_v55, %v537_v14  ;;  %v550_v55 = vld [vmem:[%s4924_s3 + $0x10] sm:$0xff] }
 0x121   : > { %v547_v54 = vsel %vm443_vm1, %v3639_v13, %v539_v57  ;;  %v551_v13 = vld [vmem:[%s4924_s3 + $0x18] sm:$0xff] }
 0x122   : > { %2910 = vmatprep.subr.bf16.mxu1 %v2909_v23  ;;  %v2913_v58 = vpack.c.bf16 %v547_v54, %v545_v10 }
 0x123   : > { %2912 = vmatpush1.bf16.msra.mxu1 %v2911_v20 }
 0x124   : > { %2914 = vmatprep.subr.bf16.mxu1 %v2913_v58 }
 0x127   : > { %2916 = vmatpush1.bf16.msra.mxu1 %v2915_v56 }
 0x12a   : > { %2814 = vmatmul.mubr.msk.f32.vlgmr.msra.gmra.mrb[4].mxu1 %vm576_vm2, %v548_v12 }
 0x12b   : > { %659 = vmatprep.mubr.f32.mxu1 %v3380_v1 }
 0x12e   : > { %2815 = vmatmul.mubr.msk.f32.gmra.mrb[6].mxu1 %vm576_vm2, %v549_v59 }
 0x12f   : > { %665 = vmatprep.mubr.f32.mxu1 %v3380_v1 }
 0x132   : > { %2816 = vmatmul.mubr.msk.f32.gmra.mrb[8].mxu1 %vm576_vm2, %v550_v55 }
 0x133   : > { %671 = vmatprep.mubr.f32.mxu1 %v3380_v1 }
 0x136   : > { %2817 = vmatmul.mubr.msk.f32.gmra.mrb[10].mxu1 %vm576_vm2, %v551_v13 }
 0x137   : > { %1171 = vmatprep.mubr.f32.mxu1 %v3380_v1 }
 0x1fd   : > { %v655_v17 = vpop.f32.mrb[4].mxu1 }
 0x1fe   : > { %v3771_v18 = vadd.f32 %v655_v17, %v559_v15  ;;  %v657_v24 = vpop.f32.mrb[5].mxu1 }
 0x1ff   : > { %v3773_v25 = vadd.f32 %v657_v24, %v559_v15 }
 0x200   : > { %v3776_v26 = vmul.f32 100.0, %v3771_v18 }
 0x201   : > { %v3779_v31 = vmul.f32 100.0, %v3773_v25  ;;  %v661_v27 = vpop.f32.mrb[6].mxu1 }
 0x202   : > { %v686_v28 = vmin.f32 %v3776_v26, 20.0  ;;  %v3782_v32 = vadd.f32 %v661_v27, %v564_v29  ;;  %v663_v30 = vpop.f32.mrb[7].mxu1  ;;  %vm694_vm4 = vcmp.gt.f32.partialorder %v3776_v26, 20.0 }
 0x203   : > { %v687_v35 = vmin.f32 %v3779_v31, 20.0  ;;  %v3785_v36 = vadd.f32 %v663_v30, %v564_v29  ;;  %vm695_vm6 = vcmp.gt.f32.partialorder %v3779_v31, 20.0 }
 0x204   : > { %v702_v38 = vmul.f32 1.442695, %v686_v28  ;;  %v3788_v39 = vmul.f32 100.0, %v3782_v32 }
 0x205   : > { %v704_v42 = vmul.f32 1.442695, %v687_v35  ;;  %v3791_v43 = vmul.f32 100.0, %v3785_v36  ;;  %v667_v44 = vpop.f32.mrb[8].mxu1 }
 0x206   : > { %3060 = vpow2.f32 %v702_v38  ;;  %v688_v45 = vmin.f32 %v3788_v39, 20.0  ;;  %v3794_v47 = vadd.f32 %v667_v44, %v569_v41  ;;  %v669_v48 = vpop.f32.mrb[9].mxu1  ;;  %vm696_vm5 = vcmp.gt.f32.partialorder %v3788_v39, 20.0 }
 0x207   : > { %3062 = vpow2.f32 %v704_v42  ;;  %v689_v49 = vmin.f32 %v3791_v43, 20.0  ;;  %v3797_v52 = vadd.f32 %v669_v48, %v569_v41  ;;  %vm697_vm7 = vcmp.gt.f32.partialorder %v3791_v43, 20.0 }
 0x208   : > { %v706_v53 = vmul.f32 1.442695, %v688_v45  ;;  %v3800_v34 = vmul.f32 100.0, %v3794_v47 }
 0x209   : > { %v708_v60 = vmul.f32 1.442695, %v689_v49  ;;  %v3803_v61 = vmul.f32 100.0, %v3797_v52  ;;  %v673_v62 = vpop.f32.mrb[10].mxu1 }
 0x20a   : > { %3064 = vpow2.f32 %v706_v53  ;;  %v690_v63 = vmin.f32 %v3800_v34, 20.0  ;;  %v3806_v0 = vadd.f32 %v673_v62, %v574_v37  ;;  %v675_v2 = vpop.f32.mrb[11].mxu1  ;;  %vm698_vm15 = vcmp.gt.f32.partialorder %v3800_v34, 20.0  ;;  %v2818_v34 = vld [vmem:[%s4924_s3 + $0x20] sm:$0xff] }
 0x20b   : > { %3066 = vpow2.f32 %v708_v60  ;;  %v691_v3 = vmin.f32 %v3803_v61, 20.0  ;;  %v3809_v4 = vadd.f32 %v675_v2, %v574_v37  ;;  %vm699_vm1 = vcmp.gt.f32.partialorder %v3803_v61, 20.0  ;;  %v2821_v61 = vld [vmem:[%s4924_s3 + $0x38] sm:$0xff] }
 0x20c   : > { %v710_v5 = vmul.f32 1.442695, %v690_v63  ;;  %v3812_v6 = vmul.f32 100.0, %v3806_v0 }
 0x20d   : > { %v712_v33 = vmul.f32 1.442695, %v691_v3  ;;  %v3815_v7 = vmul.f32 100.0, %v3809_v4 }
 0x20e   : > { %3068 = vpow2.f32 %v710_v5  ;;  %v692_v8 = vmin.f32 %v3812_v6, 20.0  ;;  %vm700_vm0 = vcmp.gt.f32.partialorder %v3812_v6, 20.0 }
 0x20f   : > { %3070 = vpow2.f32 %v712_v33  ;;  %v693_v40 = vmin.f32 %v3815_v7, 20.0 }
 0x210   : > { %v3061_v11 = vpop.eup %3060  ;;  %v714_v16 = vmul.f32 1.442695, %v692_v8 }
 0x211   : > { %v3063_v19 = vpop.eup %3062  ;;  %v718_v46 = vadd.f32 1.0, %v3061_v11  ;;  %v716_v20 = vmul.f32 1.442695, %v693_v40  ;;  %v721_v9 = vmul.f32 -0.5, %v3061_v11  ;;  %v724_v54 = vand.u32 2147483647, %v3061_v11 }
 0x212   : > { %3072 = vpow2.f32 %v714_v16  ;;  %v727_v21 = vadd.f32 1.0, %v3063_v19  ;;  %v730_v23 = vmul.f32 -0.5, %v3063_v19  ;;  %v733_v15 = vand.u32 2147483647, %v3063_v19 }
 0x213   : > { %3074 = vlog2.f32 %v718_v46  ;;  %v722_v59 = vadd.f32 1.0, %v721_v9  ;;  %vm3824_vm3 = vcmp.lt.f32.partialorder %v724_v54, 0.0004427343 }
 0x214   : > { %v3065_v22 = vpop.eup %3064  ;;  %3076 = vpow2.f32 %v716_v20  ;;  %v731_v13 = vadd.f32 1.0, %v730_v23  ;;  %vm3836_vm8 = vcmp.lt.f32.partialorder %v733_v15, 0.0004427343 }
 0x215   : > { %v3067_v56 = vpop.eup %3066  ;;  %v736_v50 = vadd.f32 1.0, %v3065_v22  ;;  %3078 = vlog2.f32 %v727_v21  ;;  %v739_v57 = vmul.f32 -0.5, %v3065_v22  ;;  %v742_v29 = vand.u32 2147483647, %v3065_v22 }
 0x216   : > { %v745_v14 = vadd.f32 1.0, %v3067_v56  ;;  %v748_v12 = vmul.f32 -0.5, %v3067_v56  ;;  %v723_v44 = vmul.f32 %v3061_v11, %v722_v59  ;;  %v751_v45 = vand.u32 2147483647, %v3067_v56 }
 0x217   : > { %3080 = vlog2.f32 %v736_v50  ;;  %v740_v24 = vadd.f32 1.0, %v739_v57  ;;  %v732_v49 = vmul.f32 %v3063_v19, %v731_v13  ;;  %vm3843_vm9 = vcmp.lt.f32.partialorder %v742_v29, 0.0004427343 }
 0x218   : > { %v3069_v51 = vpop.eup %3068  ;;  %3082 = vlog2.f32 %v745_v14  ;;  %v749_v38 = vadd.f32 1.0, %v748_v12  ;;  %vm3848_vm10 = vcmp.lt.f32.partialorder %v751_v45, 0.0004427343 }
 0x219   : > { %v3819_v10 = vpop.eup %3070  ;;  %v754_v58 = vadd.f32 1.0, %v3069_v51  ;;  %v757_v30 = vmul.f32 -0.5, %v3069_v51  ;;  %v741_v63 = vmul.f32 %v3065_v22, %v740_v24  ;;  %v760_v3 = vand.u32 2147483647, %v3069_v51 }
 0x21a   : > { %v763_v55 = vadd.f32 1.0, %v3819_v10  ;;  %v766_v48 = vmul.f32 -0.5, %v3819_v10  ;;  %v750_v40 = vmul.f32 %v3067_v56, %v749_v38  ;;  %v769_v57 = vand.u32 2147483647, %v3819_v10 }
 0x21b   : > { %3084 = vlog2.f32 %v754_v58  ;;  %v758_v33 = vadd.f32 1.0, %v757_v30  ;;  %vm3857_vm11 = vcmp.lt.f32.partialorder %v760_v3, 0.0004427343 }
 0x21c   : > { %v3822_v17 = vpop.eup %3072  ;;  %3086 = vlog2.f32 %v763_v55  ;;  %v767_v20 = vadd.f32 1.0, %v766_v48  ;;  %vm770_vm12 = vcmp.lt.f32.partialorder %v769_v57, 0.0004427343 }
 0x21d   : > { %v3075_v27 = vpop.eup %3074  ;;  %v772_v35 = vadd.f32 1.0, %v3822_v17  ;;  %v775_v19 = vmul.f32 -0.5, %v3822_v17  ;;  %v759_v12 = vmul.f32 %v3069_v51, %v758_v33  ;;  %v778_v59 = vand.u32 2147483647, %v3822_v17 }
 0x21e   : > { %v3829_v41 = vpop.eup %3076  ;;  %v720_v42 = vmul.f32 0.6931472, %v3075_v27  ;;  %v768_v27 = vmul.f32 %v3819_v10, %v767_v20 }
 0x21f   : > { %3088 = vlog2.f32 %v772_v35  ;;  %v781_v37 = vadd.f32 1.0, %v3829_v41  ;;  %v3079_v60 = vpop.eup %3078  ;;  %v784_v9 = vmul.f32 -0.5, %v3829_v41  ;;  %v776_v24 = vadd.f32 1.0, %v775_v19 }
 0x220   : > { %v726_v62 = vsel %vm3824_vm3, %v723_v44, %v720_v42  ;;  %v729_v8 = vmul.f32 0.6931472, %v3079_v60  ;;  %v787_v39 = vand.u32 2147483647, %v3829_v41  ;;  %vm779_vm13 = vcmp.lt.f32.partialorder %v778_v59, 0.0004427343 }
 0x221   : > { %v3081_v5 = vpop.eup %3080  ;;  %3090 = vlog2.f32 %v781_v37  ;;  %v790_v21 = vmul.f32 0.01, %v726_v62  ;;  %v785_v35 = vadd.f32 1.0, %v784_v9  ;;  %v777_v45 = vmul.f32 %v3822_v17, %v776_v24 }
 0x222   : > { %v3083_v11 = vpop.eup %3082  ;;  %v738_v16 = vmul.f32 0.6931472, %v3081_v5  ;;  %v735_v22 = vsel %vm3836_vm8, %v732_v49, %v729_v8  ;;  %vm788_vm14 = vcmp.lt.f32.partialorder %v787_v39, 0.0004427343  ;;  %vm701_vm3 = vcmp.gt.f32.partialorder %v3815_v7, 20.0 }
 0x223   : > { %v747_v50 = vmul.f32 0.6931472, %v3083_v11  ;;  %v791_v23 = vmul.f32 0.01, %v735_v22  ;;  %v798_v28 = vsel %vm694_vm4, %v3771_v18, %v790_v21  ;;  %v786_v31 = vmul.f32 %v3829_v41, %v785_v35 }
 0x224   : > { %v744_v56 = vsel %vm3843_vm9, %v741_v63, %v738_v16 }
 0x225   : > { %v3085_v54 = vpop.eup %3084  ;;  %v792_v58 = vmul.f32 0.01, %v744_v56  ;;  %v753_v55 = vsel %vm3848_vm10, %v750_v40, %v747_v50  ;;  %v799_v44 = vsel %vm695_vm6, %v3773_v25, %v791_v23  ;;  %v824_v40 = vpop.permute.xlu1 %823 }
 0x226   : > { %v3087_v13 = vpop.eup %3086  ;;  %v756_v15 = vmul.f32 0.6931472, %v3085_v54  ;;  %v793_v29 = vmul.f32 0.01, %v753_v55 }
 0x227   : > { %v800_v30 = vsel %vm696_vm5, %v3782_v32, %v792_v58  ;;  %v765_v51 = vmul.f32 0.6931472, %v3087_v13 }
 0x228   : > { %v2919_v38 = vpack.c.bf16 %v800_v30, %v798_v28  ;;  %v762_v42 = vsel %vm3857_vm11, %v759_v12, %v756_v15  ;;  %v801_v10 = vsel %vm697_vm7, %v3785_v36, %v793_v29 }
 0x229   : > { %v3089_v26 = vpop.eup %3088  ;;  %v2917_v18 = vpack.c.bf16 %v801_v10, %v799_v44  ;;  %v771_v48 = vsel %vm770_vm12, %v768_v27, %v765_v51  ;;  %v794_v53 = vmul.f32 0.01, %v762_v42  ;;  %v834_v24 = vpop.permute.xlu1 %833 }
 0x22a   : > { %v774_v32 = vmul.f32 0.6931472, %v3089_v26  ;;  %v795_v36 = vmul.f32 0.01, %v771_v48 }
 0x22b   : > { %v3091_v49 = vpop.eup %3090  ;;  %2918 = vmatprep.subr.bf16.mxu0 %v2917_v18  ;;  %v802_v17 = vsel %vm698_vm15, %v3794_v47, %v794_v53  ;;  %v2819_v47 = vld [vmem:[%s4924_s3 + $0x28] sm:$0xff] }
 0x22c   : > { %v780_v37 = vsel %vm779_vm13, %v777_v45, %v774_v32  ;;  %2920 = vmatpush1.bf16.msra.mxu0 %v2919_v38  ;;  %v783_v25 = vmul.f32 0.6931472, %v3091_v49  ;;  %v803_v41 = vsel %vm699_vm1, %v3797_v52, %v795_v36  ;;  %v2820_v52 = vld [vmem:[%s4924_s3 + $0x30] sm:$0xff] }
 0x22d   : > { %v796_v43 = vmul.f32 0.01, %v780_v37 }
 0x22e   : > { %v789_v60 = vsel %vm788_vm14, %v786_v31, %v783_v25 }
 0x22f   : > { %v804_v62 = vsel %vm700_vm0, %v3806_v0, %v796_v43  ;;  %v797_v63 = vmul.f32 0.01, %v789_v60  ;;  %v819_v0 = vpop.permute.xlu0 %818 }
 0x230   : > { %v2923_v2 = vpack.c.bf16 %v804_v62, %v802_v17 }
 0x231   : > { %v805_v3 = vsel %vm701_vm3, %v3809_v4, %v797_v63 }
 0x232   : > { %v2921_v5 = vpack.c.bf16 %v805_v3, %v803_v41 }
 0x233   : > { %v829_v56 = vpop.permute.xlu0 %828 }
 0x234   : > { %2922 = vmatprep.subr.bf16.mxu0 %v2921_v5 }
 0x235   : > { %2924 = vmatpush1.bf16.msra.mxu0 %v2923_v2 }
 0x238   : > { %2826 = vmatmul.mubr.msk.f32.vlgmr.msra.gmra.mrb[4].mxu0 %vm576_vm2, %v2818_v34 }
 0x239   : > { %918 = vmatprep.mubr.f32.mxu0 %v3380_v1 }
 0x23c   : > { %2827 = vmatmul.mubr.msk.f32.gmra.mrb[6].mxu0 %vm576_vm2, %v2819_v47 }
 0x23d   : > { %924 = vmatprep.mubr.f32.mxu0 %v3380_v1 }
 0x240   : > { %2828 = vmatmul.mubr.msk.f32.gmra.mrb[8].mxu0 %vm576_vm2, %v2820_v52 }
 0x241   : > { %930 = vmatprep.mubr.f32.mxu0 %v3380_v1 }
 0x244   : > { %2829 = vmatmul.mubr.msk.f32.gmra.mrb[10].mxu0 %vm576_vm2, %v2821_v61 }
 0x245   : > { %1430 = vmatprep.mubr.f32.mxu0 %v3380_v1 }
 0x30b   : > { %v914_v4 = vpop.f32.mrb[4].mxu0 }
 0x30c   : > { %v3911_v6 = vadd.f32 %v914_v4, %v819_v0  ;;  %v916_v7 = vpop.f32.mrb[5].mxu0 }
 0x30d   : > { %v3913_v33 = vadd.f32 %v916_v7, %v819_v0 }
 0x30e   : > { %v3916_v8 = vmul.f32 100.0, %v3911_v6 }
 0x30f   : > { %v3919_v11 = vmul.f32 100.0, %v3913_v33  ;;  %v920_v16 = vpop.f32.mrb[6].mxu0 }
 0x310   : > { %v945_v19 = vmin.f32 %v3916_v8, 20.0  ;;  %v3922_v46 = vadd.f32 %v920_v16, %v824_v40  ;;  %v922_v20 = vpop.f32.mrb[7].mxu0  ;;  %vm953_vm5 = vcmp.gt.f32.partialorder %v3916_v8, 20.0 }
 0x311   : > { %v946_v21 = vmin.f32 %v3919_v11, 20.0  ;;  %v3925_v22 = vadd.f32 %v922_v20, %v824_v40  ;;  %vm954_vm7 = vcmp.gt.f32.partialorder %v3919_v11, 20.0 }
 0x312   : > { %v961_v50 = vmul.f32 1.442695, %v945_v19  ;;  %v3928_v9 = vmul.f32 100.0, %v3922_v46 }
 0x313   : > { %v963_v14 = vmul.f32 1.442695, %v946_v21  ;;  %v3931_v23 = vmul.f32 100.0, %v3925_v22  ;;  %v926_v57 = vpop.f32.mrb[8].mxu0 }
 0x314   : > { %3092 = vpow2.f32 %v961_v50  ;;  %v947_v54 = vmin.f32 %v3928_v9, 20.0  ;;  %v3934_v58 = vadd.f32 %v926_v57, %v829_v56  ;;  %v928_v12 = vpop.f32.mrb[9].mxu0  ;;  %vm955_vm6 = vcmp.gt.f32.partialorder %v3928_v9, 20.0 }
 0x315   : > { %3094 = vpow2.f32 %v963_v14  ;;  %v948_v59 = vmin.f32 %v3931_v23, 20.0  ;;  %v3937_v55 = vadd.f32 %v928_v12, %v829_v56  ;;  %vm956_vm8 = vcmp.gt.f32.partialorder %v3931_v23, 20.0 }
 0x316   : > { %v965_v13 = vmul.f32 1.442695, %v947_v54  ;;  %v3940_v15 = vmul.f32 100.0, %v3934_v58 }
 0x317   : > { %v967_v29 = vmul.f32 1.442695, %v948_v59  ;;  %v3943_v27 = vmul.f32 100.0, %v3937_v55  ;;  %v932_v28 = vpop.f32.mrb[10].mxu0 }
 0x318   : > { %3096 = vpow2.f32 %v965_v13  ;;  %v949_v30 = vmin.f32 %v3940_v15, 20.0  ;;  %v3946_v51 = vadd.f32 %v932_v28, %v834_v24  ;;  %v934_v35 = vpop.f32.mrb[11].mxu0  ;;  %vm957_vm0 = vcmp.gt.f32.partialorder %v3940_v15, 20.0  ;;  %v2830_v15 = vld [vmem:[%s4924_s3 + $0x40] sm:$0xff] }
 0x319   : > { %3098 = vpow2.f32 %v967_v29  ;;  %v950_v38 = vmin.f32 %v3943_v27, 20.0  ;;  %v3949_v42 = vadd.f32 %v934_v35, %v834_v24  ;;  %vm958_vm3 = vcmp.gt.f32.partialorder %v3943_v27, 20.0  ;;  %v2833_v27 = vld [vmem:[%s4924_s3 + $0x58] sm:$0xff] }
 0x31a   : > { %v969_v44 = vmul.f32 1.442695, %v949_v30  ;;  %v3952_v10 = vmul.f32 100.0, %v3946_v51 }
 0x31b   : > { %v971_v26 = vmul.f32 1.442695, %v950_v38  ;;  %v3955_v18 = vmul.f32 100.0, %v3949_v42 }
 0x31c   : > { %3100 = vpow2.f32 %v969_v44  ;;  %v951_v39 = vmin.f32 %v3952_v10, 20.0  ;;  %vm959_vm1 = vcmp.gt.f32.partialorder %v3952_v10, 20.0 }
 0x31d   : > { %3102 = vpow2.f32 %v971_v26  ;;  %v952_v32 = vmin.f32 %v3955_v18, 20.0 }
 0x31e   : > { %v3093_v45 = vpop.eup %3092  ;;  %v973_v48 = vmul.f32 1.442695, %v951_v39 }
 0x31f   : > { %v3095_v49 = vpop.eup %3094  ;;  %v977_v53 = vadd.f32 1.0, %v3093_v45  ;;  %v975_v37 = vmul.f32 1.442695, %v952_v32  ;;  %v980_v60 = vmul.f32 -0.5, %v3093_v45  ;;  %v983_v3 = vand.u32 2147483647, %v3093_v45 }
 0x320   : > { %3104 = vpow2.f32 %v973_v48  ;;  %v986_v25 = vadd.f32 1.0, %v3095_v49  ;;  %v989_v62 = vmul.f32 -0.5, %v3095_v49  ;;  %v992_v0 = vand.u32 2147483647, %v3095_v49 }
 0x321   : > { %3106 = vlog2.f32 %v977_v53  ;;  %v981_v47 = vadd.f32 1.0, %v980_v60  ;;  %vm3964_vm4 = vcmp.lt.f32.partialorder %v983_v3, 0.0004427343 }
 0x322   : > { %v3097_v31 = vpop.eup %3096  ;;  %3108 = vpow2.f32 %v975_v37  ;;  %v990_v61 = vadd.f32 1.0, %v989_v62  ;;  %vm3976_vm9 = vcmp.lt.f32.partialorder %v992_v0, 0.0004427343 }
 0x323   : > { %v3099_v43 = vpop.eup %3098  ;;  %v995_v36 = vadd.f32 1.0, %v3097_v31  ;;  %3110 = vlog2.f32 %v986_v25  ;;  %v998_v2 = vmul.f32 -0.5, %v3097_v31  ;;  %v1001_v40 = vand.u32 2147483647, %v3097_v31 }
 0x324   : > { %v1004_v17 = vadd.f32 1.0, %v3099_v43  ;;  %v1007_v34 = vmul.f32 -0.5, %v3099_v43  ;;  %v982_v57 = vmul.f32 %v3093_v45, %v981_v47  ;;  %v1010_v54 = vand.u32 2147483647, %v3099_v43 }
 0x325   : > { %3112 = vlog2.f32 %v995_v36  ;;  %v999_v7 = vadd.f32 1.0, %v998_v2  ;;  %v991_v59 = vmul.f32 %v3095_v49, %v990_v61  ;;  %vm3983_vm10 = vcmp.lt.f32.partialorder %v1001_v40, 0.0004427343 }
 0x326   : > { %v3101_v63 = vpop.eup %3100  ;;  %3114 = vlog2.f32 %v1004_v17  ;;  %v1008_v50 = vadd.f32 1.0, %v1007_v34  ;;  %vm3988_vm11 = vcmp.lt.f32.partialorder %v1010_v54, 0.0004427343 }
 0x327   : > { %v3959_v41 = vpop.eup %3102  ;;  %v1013_v5 = vadd.f32 1.0, %v3101_v63  ;;  %v1016_v20 = vmul.f32 -0.5, %v3101_v63  ;;  %v1000_v30 = vmul.f32 %v3097_v31, %v999_v7  ;;  %v1019_v38 = vand.u32 2147483647, %v3101_v63 }
 0x328   : > { %v1022_v52 = vadd.f32 1.0, %v3959_v41  ;;  %v1025_v12 = vmul.f32 -0.5, %v3959_v41  ;;  %v1009_v32 = vmul.f32 %v3099_v43, %v1008_v50  ;;  %v1028_v2 = vand.u32 2147483647, %v3959_v41 }
 0x329   : > { %3116 = vlog2.f32 %v1013_v5  ;;  %v1017_v26 = vadd.f32 1.0, %v1016_v20  ;;  %vm3997_vm12 = vcmp.lt.f32.partialorder %v1019_v38, 0.0004427343 }
 0x32a   : > { %v3962_v4 = vpop.eup %3104  ;;  %3118 = vlog2.f32 %v1022_v52  ;;  %v1026_v37 = vadd.f32 1.0, %v1025_v12  ;;  %vm1029_vm13 = vcmp.lt.f32.partialorder %v1028_v2, 0.0004427343 }
 0x32b   : > { %v3107_v16 = vpop.eup %3106  ;;  %v1031_v21 = vadd.f32 1.0, %v3962_v4  ;;  %v1034_v49 = vmul.f32 -0.5, %v3962_v4  ;;  %v1018_v34 = vmul.f32 %v3101_v63, %v1017_v26  ;;  %v1037_v47 = vand.u32 2147483647, %v3962_v4 }
 0x32c   : > { %v3969_v56 = vpop.eup %3108  ;;  %v979_v14 = vmul.f32 0.6931472, %v3107_v16  ;;  %v1027_v16 = vmul.f32 %v3959_v41, %v1026_v37 }
 0x32d   : > { %3120 = vlog2.f32 %v1031_v21  ;;  %v1040_v24 = vadd.f32 1.0, %v3969_v56  ;;  %v3111_v29 = vpop.eup %3110  ;;  %v1043_v60 = vmul.f32 -0.5, %v3969_v56  ;;  %v1035_v7 = vadd.f32 1.0, %v1034_v49 }
 0x32e   : > { %v985_v28 = vsel %vm3964_vm4, %v982_v57, %v979_v14  ;;  %v988_v39 = vmul.f32 0.6931472, %v3111_v29  ;;  %v1046_v9 = vand.u32 2147483647, %v3969_v56  ;;  %vm1038_vm14 = vcmp.lt.f32.partialorder %v1037_v47, 0.0004427343 }
 0x32f   : > { %v3113_v44 = vpop.eup %3112  ;;  %3122 = vlog2.f32 %v1040_v24  ;;  %v1049_v25 = vmul.f32 0.01, %v985_v28  ;;  %v1044_v21 = vadd.f32 1.0, %v1043_v60  ;;  %v1036_v54 = vmul.f32 %v3962_v4, %v1035_v7 }
 0x330   : > { %v3115_v45 = vpop.eup %3114  ;;  %v997_v48 = vmul.f32 0.6931472, %v3113_v44  ;;  %v994_v31 = vsel %vm3976_vm9, %v991_v59, %v988_v39  ;;  %vm1047_vm15 = vcmp.lt.f32.partialorder %v1046_v9, 0.0004427343  ;;  %vm960_vm4 = vcmp.gt.f32.partialorder %v3955_v18, 20.0 }
 0x331   : > { %v1006_v36 = vmul.f32 0.6931472, %v3115_v45  ;;  %v1050_v62 = vmul.f32 0.01, %v994_v31  ;;  %v1057_v19 = vsel %vm953_vm5, %v3911_v6, %v1049_v25  ;;  %v1045_v11 = vmul.f32 %v3969_v56, %v1044_v21 }
 0x332   : > { %v1003_v43 = vsel %vm3983_vm10, %v1000_v30, %v997_v48 }
 0x333   : > { %v3117_v3 = vpop.eup %3116  ;;  %v1051_v5 = vmul.f32 0.01, %v1003_v43  ;;  %v1012_v52 = vsel %vm3988_vm11, %v1009_v32, %v1006_v36  ;;  %v1058_v57 = vsel %vm954_vm7, %v3913_v33, %v1050_v62  ;;  %v1083_v32 = vpop.permute.xlu1 %1082 }
 0x334   : > { %v3119_v61 = vpop.eup %3118  ;;  %v1015_v0 = vmul.f32 0.6931472, %v3117_v3  ;;  %v1052_v40 = vmul.f32 0.01, %v1012_v52 }
 0x335   : > { %v1059_v20 = vsel %vm955_vm6, %v3922_v46, %v1051_v5  ;;  %v1024_v63 = vmul.f32 0.6931472, %v3119_v61 }
 0x336   : > { %v2927_v50 = vpack.c.bf16 %v1059_v20, %v1057_v19  ;;  %v1021_v14 = vsel %vm3997_vm12, %v1018_v34, %v1015_v0  ;;  %v1060_v41 = vsel %vm956_vm8, %v3925_v22, %v1052_v40 }
 0x337   : > { %v3121_v8 = vpop.eup %3120  ;;  %v2925_v6 = vpack.c.bf16 %v1060_v41, %v1058_v57  ;;  %v1030_v12 = vsel %vm1029_vm13, %v1027_v16, %v1024_v63  ;;  %v1053_v13 = vmul.f32 0.01, %v1021_v14  ;;  %v1093_v7 = vpop.permute.xlu1 %1092 }
 0x338   : > { %v1033_v46 = vmul.f32 0.6931472, %v3121_v8  ;;  %v1054_v22 = vmul.f32 0.01, %v1030_v12 }
 0x339   : > { %v3123_v59 = vpop.eup %3122  ;;  %2926 = vmatprep.subr.bf16.mxu1 %v2925_v6  ;;  %v1061_v4 = vsel %vm957_vm0, %v3934_v58, %v1053_v13  ;;  %v2831_v58 = vld [vmem:[%s4924_s3 + $0x48] sm:$0xff] }
 0x33a   : > { %v1039_v24 = vsel %vm1038_vm14, %v1036_v54, %v1033_v46  ;;  %2928 = vmatpush1.bf16.msra.mxu1 %v2927_v50  ;;  %v1042_v33 = vmul.f32 0.6931472, %v3123_v59  ;;  %v1062_v56 = vsel %vm958_vm3, %v3937_v55, %v1054_v22  ;;  %v2832_v55 = vld [vmem:[%s4924_s3 + $0x50] sm:$0xff] }
 0x33b   : > { %v1055_v23 = vmul.f32 0.01, %v1039_v24 }
 0x33c   : > { %v1048_v29 = vsel %vm1047_vm15, %v1045_v11, %v1042_v33 }
 0x33d   : > { %v1063_v28 = vsel %vm959_vm1, %v3946_v51, %v1055_v23  ;;  %v1056_v30 = vmul.f32 0.01, %v1048_v29  ;;  %v1078_v51 = vpop.permute.xlu0 %1077 }
 0x33e   : > { %v2931_v35 = vpack.c.bf16 %v1063_v28, %v1061_v4 }
 0x33f   : > { %v1064_v38 = vsel %vm960_vm4, %v3949_v42, %v1056_v30 }
 0x340   : > { %v2929_v44 = vpack.c.bf16 %v1064_v38, %v1062_v56 }
 0x341   : > { %v1088_v43 = vpop.permute.xlu0 %1087 }
 0x342   : > { %2930 = vmatprep.subr.bf16.mxu1 %v2929_v44 }
 0x343   : > { %2932 = vmatpush1.bf16.msra.mxu1 %v2931_v35 }
 0x346   : > { %2838 = vmatmul.mubr.msk.f32.vlgmr.msra.gmra.mrb[12].mxu1 %vm576_vm2, %v2830_v15 }
 0x347   : > { %1177 = vmatprep.mubr.f32.mxu1 %v3380_v1 }
 0x34a   : > { %2839 = vmatmul.mubr.msk.f32.gmra.mrb[14].mxu1 %vm576_vm2, %v2831_v58 }
 0x34b   : > { %1183 = vmatprep.mubr.f32.mxu1 %v3380_v1 }
 0x34e   : > { %2840 = vmatmul.mubr.msk.f32.gmra.mrb[16].mxu1 %vm576_vm2, %v2832_v55 }
 0x34f   : > { %1189 = vmatprep.mubr.f32.mxu1 %v3380_v1 }
 0x352   : > { %2841 = vmatmul.mubr.msk.f32.gmra.mrb[18].mxu1 %vm576_vm2, %v2833_v27 }
 0x353   : > { %1689 = vmatprep.mubr.f32.mxu1 %v3380_v1 }
 0x419   : > { %v1173_v42 = vpop.f32.mrb[12].mxu1 }
 0x41a   : > { %v4051_v10 = vadd.f32 %v1173_v42, %v1078_v51  ;;  %v1175_v18 = vpop.f32.mrb[13].mxu1 }
 0x41b   : > { %v4053_v26 = vadd.f32 %v1175_v18, %v1078_v51 }
 0x41c   : > { %v4056_v39 = vmul.f32 100.0, %v4051_v10 }
 0x41d   : > { %v4059_v45 = vmul.f32 100.0, %v4053_v26  ;;  %v1179_v48 = vpop.f32.mrb[14].mxu1 }
 0x41e   : > { %v1204_v49 = vmin.f32 %v4056_v39, 20.0  ;;  %v4062_v53 = vadd.f32 %v1179_v48, %v1083_v32  ;;  %v1181_v37 = vpop.f32.mrb[15].mxu1  ;;  %vm1212_vm6 = vcmp.gt.f32.partialorder %v4056_v39, 20.0 }
 0x41f   : > { %v1205_v25 = vmin.f32 %v4059_v45, 20.0  ;;  %v4065_v31 = vadd.f32 %v1181_v37, %v1083_v32  ;;  %vm1213_vm8 = vcmp.gt.f32.partialorder %v4059_v45, 20.0 }
 0x420   : > { %v1220_v36 = vmul.f32 1.442695, %v1204_v49  ;;  %v4068_v60 = vmul.f32 100.0, %v4062_v53 }
 0x421   : > { %v1222_v17 = vmul.f32 1.442695, %v1205_v25  ;;  %v4071_v62 = vmul.f32 100.0, %v4065_v31  ;;  %v1185_v2 = vpop.f32.mrb[16].mxu1 }
 0x422   : > { %3124 = vpow2.f32 %v1220_v36  ;;  %v1206_v3 = vmin.f32 %v4068_v60, 20.0  ;;  %v4074_v5 = vadd.f32 %v1185_v2, %v1088_v43  ;;  %v1187_v34 = vpop.f32.mrb[17].mxu1  ;;  %vm1214_vm7 = vcmp.gt.f32.partialorder %v4068_v60, 20.0 }
 0x423   : > { %3126 = vpow2.f32 %v1222_v17  ;;  %v1207_v47 = vmin.f32 %v4071_v62, 20.0  ;;  %v4077_v52 = vadd.f32 %v1187_v34, %v1088_v43  ;;  %vm1215_vm9 = vcmp.gt.f32.partialorder %v4071_v62, 20.0 }
 0x424   : > { %v1224_v61 = vmul.f32 1.442695, %v1206_v3  ;;  %v4080_v0 = vmul.f32 100.0, %v4074_v5 }
 0x425   : > { %v1226_v40 = vmul.f32 1.442695, %v1207_v47  ;;  %v4083_v16 = vmul.f32 100.0, %v4077_v52  ;;  %v1191_v19 = vpop.f32.mrb[18].mxu1 }
 0x426   : > { %3128 = vpow2.f32 %v1224_v61  ;;  %v1208_v20 = vmin.f32 %v4080_v0, 20.0  ;;  %v4086_v63 = vadd.f32 %v1191_v19, %v1093_v7  ;;  %v1193_v21 = vpop.f32.mrb[19].mxu1  ;;  %vm1216_vm1 = vcmp.gt.f32.partialorder %v4080_v0, 20.0  ;;  %v2842_v0 = vld [vmem:[%s4924_s3 + $0x60] sm:$0xff] }
 0x427   : > { %3130 = vpow2.f32 %v1226_v40  ;;  %v1209_v50 = vmin.f32 %v4083_v16, 20.0  ;;  %v4089_v14 = vadd.f32 %v1193_v21, %v1093_v7  ;;  %vm1217_vm4 = vcmp.gt.f32.partialorder %v4083_v16, 20.0  ;;  %v2845_v16 = vld [vmem:[%s4924_s3 + $0x78] sm:$0xff] }
 0x428   : > { %v1228_v57 = vmul.f32 1.442695, %v1208_v20  ;;  %v4092_v41 = vmul.f32 100.0, %v4086_v63 }
 0x429   : > { %v1230_v8 = vmul.f32 1.442695, %v1209_v50  ;;  %v4095_v6 = vmul.f32 100.0, %v4089_v14 }
 0x42a   : > { %3132 = vpow2.f32 %v1228_v57  ;;  %v1210_v9 = vmin.f32 %v4092_v41, 20.0  ;;  %vm1218_vm3 = vcmp.gt.f32.partialorder %v4092_v41, 20.0 }
 0x42b   : > { %3134 = vpow2.f32 %v1230_v8  ;;  %v1211_v46 = vmin.f32 %v4095_v6, 20.0 }
 0x42c   : > { %v3125_v54 = vpop.eup %3124  ;;  %v1232_v12 = vmul.f32 1.442695, %v1210_v9 }
 0x42d   : > { %v3127_v59 = vpop.eup %3126  ;;  %v1236_v13 = vadd.f32 1.0, %v3125_v54  ;;  %v1234_v24 = vmul.f32 1.442695, %v1211_v46  ;;  %v1239_v29 = vmul.f32 -0.5, %v3125_v54  ;;  %v1242_v38 = vand.u32 2147483647, %v3125_v54 }
 0x42e   : > { %3136 = vpow2.f32 %v1232_v12  ;;  %v1245_v33 = vadd.f32 1.0, %v3127_v59  ;;  %v1248_v28 = vmul.f32 -0.5, %v3127_v59  ;;  %v1251_v51 = vand.u32 2147483647, %v3127_v59 }
 0x42f   : > { %3138 = vlog2.f32 %v1236_v13  ;;  %v1240_v58 = vadd.f32 1.0, %v1239_v29  ;;  %vm4104_vm5 = vcmp.lt.f32.partialorder %v1242_v38, 0.0004427343 }
 0x430   : > { %v3129_v11 = vpop.eup %3128  ;;  %3140 = vpow2.f32 %v1234_v24  ;;  %v1249_v27 = vadd.f32 1.0, %v1248_v28  ;;  %vm4116_vm10 = vcmp.lt.f32.partialorder %v1251_v51, 0.0004427343 }
 0x431   : > { %v3131_v23 = vpop.eup %3130  ;;  %v1254_v22 = vadd.f32 1.0, %v3129_v11  ;;  %3142 = vlog2.f32 %v1245_v33  ;;  %v1257_v35 = vmul.f32 -0.5, %v3129_v11  ;;  %v1260_v32 = vand.u32 2147483647, %v3129_v11 }
 0x432   : > { %v1263_v4 = vadd.f32 1.0, %v3131_v23  ;;  %v1266_v15 = vmul.f32 -0.5, %v3131_v23  ;;  %v1241_v2 = vmul.f32 %v3125_v54, %v1240_v58  ;;  %v1269_v3 = vand.u32 2147483647, %v3131_v23 }
 0x433   : > { %3144 = vlog2.f32 %v1254_v22  ;;  %v1258_v18 = vadd.f32 1.0, %v1257_v35  ;;  %v1250_v47 = vmul.f32 %v3127_v59, %v1249_v27  ;;  %vm4123_vm11 = vcmp.lt.f32.partialorder %v1260_v32, 0.0004427343 }
 0x434   : > { %v3133_v30 = vpop.eup %3132  ;;  %3146 = vlog2.f32 %v1263_v4  ;;  %v1267_v36 = vadd.f32 1.0, %v1266_v15  ;;  %vm4128_vm12 = vcmp.lt.f32.partialorder %v1269_v3, 0.0004427343 }
 0x435   : > { %v4099_v56 = vpop.eup %3134  ;;  %v1272_v44 = vadd.f32 1.0, %v3133_v30  ;;  %v1275_v37 = vmul.f32 -0.5, %v3133_v30  ;;  %v1259_v20 = vmul.f32 %v3129_v11, %v1258_v18  ;;  %v1278_v50 = vand.u32 2147483647, %v3133_v30 }
 0x436   : > { %v1281_v55 = vadd.f32 1.0, %v4099_v56  ;;  %v1284_v34 = vmul.f32 -0.5, %v4099_v56  ;;  %v1268_v46 = vmul.f32 %v3131_v23, %v1267_v36  ;;  %v1287_v35 = vand.u32 2147483647, %v4099_v56 }
 0x437   : > { %3148 = vlog2.f32 %v1272_v44  ;;  %v1276_v8 = vadd.f32 1.0, %v1275_v37  ;;  %vm4137_vm13 = vcmp.lt.f32.partialorder %v1278_v50, 0.0004427343 }
 0x438   : > { %v4102_v42 = vpop.eup %3136  ;;  %3150 = vlog2.f32 %v1281_v55  ;;  %v1285_v24 = vadd.f32 1.0, %v1284_v34  ;;  %vm1288_vm14 = vcmp.lt.f32.partialorder %v1287_v35, 0.0004427343 }
 0x439   : > { %v3139_v48 = vpop.eup %3138  ;;  %v1290_v25 = vadd.f32 1.0, %v4102_v42  ;;  %v1293_v59 = vmul.f32 -0.5, %v4102_v42  ;;  %v1277_v15 = vmul.f32 %v3133_v30, %v1276_v8  ;;  %v1296_v58 = vand.u32 2147483647, %v4102_v42 }
 0x43a   : > { %v4109_v43 = vpop.eup %3140  ;;  %v1238_v17 = vmul.f32 0.6931472, %v3139_v48  ;;  %v1286_v48 = vmul.f32 %v4099_v56, %v1285_v24 }
 0x43b   : > { %3152 = vlog2.f32 %v1290_v25  ;;  %v1299_v7 = vadd.f32 1.0, %v4109_v43  ;;  %v3143_v40 = vpop.eup %3142  ;;  %v1302_v29 = vmul.f32 -0.5, %v4109_v43  ;;  %v1294_v18 = vadd.f32 1.0, %v1293_v59 }
 0x43c   : > { %v1244_v19 = vsel %vm4104_vm5, %v1241_v2, %v1238_v17  ;;  %v1247_v9 = vmul.f32 0.6931472, %v3143_v40  ;;  %v1305_v60 = vand.u32 2147483647, %v4109_v43  ;;  %vm1297_vm15 = vcmp.lt.f32.partialorder %v1296_v58, 0.0004427343 }
 0x43d   : > { %v3145_v57 = vpop.eup %3144  ;;  %3154 = vlog2.f32 %v1299_v7  ;;  %v1308_v33 = vmul.f32 0.01, %v1244_v19  ;;  %v1303_v25 = vadd.f32 1.0, %v1302_v29  ;;  %v1295_v3 = vmul.f32 %v4102_v42, %v1294_v18 }
 0x43e   : > { %v3147_v54 = vpop.eup %3146  ;;  %v1256_v12 = vmul.f32 0.6931472, %v3145_v57  ;;  %v1253_v11 = vsel %vm4116_vm10, %v1250_v47, %v1247_v9  ;;  %vm1306_vm0 = vcmp.lt.f32.partialorder %v1305_v60, 0.0004427343  ;;  %vm1219_vm5 = vcmp.gt.f32.partialorder %v4095_v6, 20.0 }
 0x43f   : > { %v1265_v22 = vmul.f32 0.6931472, %v3147_v54  ;;  %v1309_v28 = vmul.f32 0.01, %v1253_v11  ;;  %v1316_v49 = vsel %vm1212_vm6, %v4051_v10, %v1308_v33  ;;  %v1304_v45 = vmul.f32 %v4109_v43, %v1303_v25 }
 0x440   : > { %v1262_v23 = vsel %vm4123_vm11, %v1259_v20, %v1256_v12 }
 0x441   : > { %v3149_v38 = vpop.eup %3148  ;;  %v1310_v44 = vmul.f32 0.01, %v1262_v23  ;;  %v1271_v55 = vsel %vm4128_vm12, %v1268_v46, %v1265_v22  ;;  %v1317_v2 = vsel %vm1213_vm8, %v4053_v26, %v1309_v28  ;;  %v1342_v46 = vpop.permute.xlu1 %1341 }
 0x442   : > { %v3151_v27 = vpop.eup %3150  ;;  %v1274_v51 = vmul.f32 0.6931472, %v3149_v38  ;;  %v1311_v32 = vmul.f32 0.01, %v1271_v55 }
 0x443   : > { %v1318_v37 = vsel %vm1214_vm7, %v4062_v53, %v1310_v44  ;;  %v1283_v30 = vmul.f32 0.6931472, %v3151_v27 }
 0x444   : > { %v2935_v36 = vpack.c.bf16 %v1318_v37, %v1316_v49  ;;  %v1280_v17 = vsel %vm4137_vm13, %v1277_v15, %v1274_v51  ;;  %v1319_v56 = vsel %vm1215_vm9, %v4065_v31, %v1311_v32 }
 0x445   : > { %v3153_v39 = vpop.eup %3152  ;;  %v2933_v10 = vpack.c.bf16 %v1319_v56, %v1317_v2  ;;  %v1289_v34 = vsel %vm1288_vm14, %v1286_v48, %v1283_v30  ;;  %v1312_v61 = vmul.f32 0.01, %v1280_v17  ;;  %v1352_v18 = vpop.permute.xlu1 %1351 }
 0x446   : > { %v1292_v53 = vmul.f32 0.6931472, %v3153_v39  ;;  %v1313_v31 = vmul.f32 0.01, %v1289_v34 }
 0x447   : > { %v3155_v47 = vpop.eup %3154  ;;  %2934 = vmatprep.subr.bf16.mxu0 %v2933_v10  ;;  %v1320_v42 = vsel %vm1216_vm1, %v4074_v5, %v1312_v61  ;;  %v2843_v5 = vld [vmem:[%s4924_s3 + $0x68] sm:$0xff] }
 0x448   : > { %v1298_v7 = vsel %vm1297_vm15, %v1295_v3, %v1292_v53  ;;  %2936 = vmatpush1.bf16.msra.mxu0 %v2935_v36  ;;  %v1301_v26 = vmul.f32 0.6931472, %v3155_v47  ;;  %v1321_v43 = vsel %vm1217_vm4, %v4077_v52, %v1313_v31  ;;  %v2844_v52 = vld [vmem:[%s4924_s3 + $0x70] sm:$0xff] }
 0x449   : > { %v1314_v62 = vmul.f32 0.01, %v1298_v7 }
 0x44a   : > { %v1307_v40 = vsel %vm1306_vm0, %v1304_v45, %v1301_v26 }
 0x44b   : > { %v1322_v19 = vsel %vm1218_vm3, %v4086_v63, %v1314_v62  ;;  %v1315_v20 = vmul.f32 0.01, %v1307_v40  ;;  %v1337_v63 = vpop.permute.xlu0 %1336 }
 0x44c   : > { %v2939_v21 = vpack.c.bf16 %v1322_v19, %v1320_v42 }
 0x44d   : > { %v1323_v50 = vsel %vm1219_vm5, %v4089_v14, %v1315_v20 }
 0x44e   : > { %v2937_v57 = vpack.c.bf16 %v1323_v50, %v1321_v43 }
 0x44f   : > { %v1347_v23 = vpop.permute.xlu0 %1346 }
 0x450   : > { %2938 = vmatprep.subr.bf16.mxu0 %v2937_v57 }
 0x451   : > { %2940 = vmatpush1.bf16.msra.mxu0 %v2939_v21 }
 0x454   : > { %2850 = vmatmul.mubr.msk.f32.vlgmr.msra.gmra.mrb[12].mxu0 %vm576_vm2, %v2842_v0 }
 0x455   : > { %1436 = vmatprep.mubr.f32.mxu0 %v3380_v1 }
 0x458   : > { %2851 = vmatmul.mubr.msk.f32.gmra.mrb[14].mxu0 %vm576_vm2, %v2843_v5 }
 0x459   : > { %1442 = vmatprep.mubr.f32.mxu0 %v3380_v1 }
 0x45c   : > { %2852 = vmatmul.mubr.msk.f32.gmra.mrb[16].mxu0 %vm576_vm2, %v2844_v52 }
 0x45d   : > { %1448 = vmatprep.mubr.f32.mxu0 %v3380_v1 }
 0x460   : > { %2853 = vmatmul.mubr.msk.f32.gmra.mrb[18].mxu0 %vm576_vm2, %v2845_v16 }
 0x461   : > { %1948 = vmatprep.mubr.f32.mxu0 %v3380_v1 }
 0x527   : > { %v1432_v14 = vpop.f32.mrb[12].mxu0 }
 0x528   : > { %v4191_v41 = vadd.f32 %v1432_v14, %v1337_v63  ;;  %v1434_v6 = vpop.f32.mrb[13].mxu0 }
 0x529   : > { %v4193_v8 = vadd.f32 %v1434_v6, %v1337_v63 }
 0x52a   : > { %v4196_v9 = vmul.f32 100.0, %v4191_v41 }
 0x52b   : > { %v4199_v54 = vmul.f32 100.0, %v4193_v8  ;;  %v1438_v12 = vpop.f32.mrb[14].mxu0 }
 0x52c   : > { %v1463_v59 = vmin.f32 %v4196_v9, 20.0  ;;  %v4202_v13 = vadd.f32 %v1438_v12, %v1342_v46  ;;  %v1440_v24 = vpop.f32.mrb[15].mxu0  ;;  %vm1471_vm7 = vcmp.gt.f32.partialorder %v4196_v9, 20.0 }
 0x52d   : > { %v1464_v33 = vmin.f32 %v4199_v54, 20.0  ;;  %v4205_v11 = vadd.f32 %v1440_v24, %v1342_v46  ;;  %vm1472_vm9 = vcmp.gt.f32.partialorder %v4199_v54, 20.0 }
 0x52e   : > { %v1479_v22 = vmul.f32 1.442695, %v1463_v59  ;;  %v4208_v29 = vmul.f32 100.0, %v4202_v13 }
 0x52f   : > { %v1481_v4 = vmul.f32 1.442695, %v1464_v33  ;;  %v4211_v28 = vmul.f32 100.0, %v4205_v11  ;;  %v1444_v35 = vpop.f32.mrb[16].mxu0 }
 0x530   : > { %3156 = vpow2.f32 %v1479_v22  ;;  %v1465_v38 = vmin.f32 %v4208_v29, 20.0  ;;  %v4214_v44 = vadd.f32 %v1444_v35, %v1347_v23  ;;  %v1446_v15 = vpop.f32.mrb[17].mxu0  ;;  %vm1473_vm8 = vcmp.gt.f32.partialorder %v4208_v29, 20.0 }
 0x531   : > { %3158 = vpow2.f32 %v1481_v4  ;;  %v1466_v58 = vmin.f32 %v4211_v28, 20.0  ;;  %v4217_v55 = vadd.f32 %v1446_v15, %v1347_v23  ;;  %vm1474_vm10 = vcmp.gt.f32.partialorder %v4211_v28, 20.0 }
 0x532   : > { %v1483_v27 = vmul.f32 1.442695, %v1465_v38  ;;  %v4220_v51 = vmul.f32 100.0, %v4214_v44 }
 0x533   : > { %v1485_v32 = vmul.f32 1.442695, %v1466_v58  ;;  %v4223_v48 = vmul.f32 100.0, %v4217_v55  ;;  %v1450_v49 = vpop.f32.mrb[18].mxu0 }
 0x534   : > { %3160 = vpow2.f32 %v1483_v27  ;;  %v1467_v37 = vmin.f32 %v4220_v51, 20.0  ;;  %v4226_v30 = vadd.f32 %v1450_v49, %v1352_v18  ;;  %v1452_v25 = vpop.f32.mrb[19].mxu0  ;;  %vm1475_vm3 = vcmp.gt.f32.partialorder %v4220_v51, 20.0  ;;  %v2854_v51 = vld [vmem:[%s4924_s3 + $0x80] sm:$0xff] }
 0x535   : > { %3162 = vpow2.f32 %v1485_v32  ;;  %v1468_v36 = vmin.f32 %v4223_v48, 20.0  ;;  %v4229_v17 = vadd.f32 %v1452_v25, %v1352_v18  ;;  %vm1476_vm5 = vcmp.gt.f32.partialorder %v4223_v48, 20.0  ;;  %v2857_v48 = vld [vmem:[%s4924_s3 + $0x98] sm:$0xff] }
 0x536   : > { %v1487_v2 = vmul.f32 1.442695, %v1467_v37  ;;  %v4232_v56 = vmul.f32 100.0, %v4226_v30 }
 0x537   : > { %v1489_v39 = vmul.f32 1.442695, %v1468_v36  ;;  %v4235_v10 = vmul.f32 100.0, %v4229_v17 }
 0x538   : > { %3164 = vpow2.f32 %v1487_v2  ;;  %v1469_v60 = vmin.f32 %v4232_v56, 20.0  ;;  %vm1477_vm4 = vcmp.gt.f32.partialorder %v4232_v56, 20.0 }
 0x539   : > { %3166 = vpow2.f32 %v1489_v39  ;;  %v1470_v53 = vmin.f32 %v4235_v10, 20.0 }
 0x53a   : > { %v3157_v3 = vpop.eup %3156  ;;  %v1491_v34 = vmul.f32 1.442695, %v1469_v60 }
 0x53b   : > { %v3159_v47 = vpop.eup %3158  ;;  %v1495_v61 = vadd.f32 1.0, %v3157_v3  ;;  %v1493_v7 = vmul.f32 1.442695, %v1470_v53  ;;  %v1498_v40 = vmul.f32 -0.5, %v3157_v3  ;;  %v1501_v50 = vand.u32 2147483647, %v3157_v3 }
 0x53c   : > { %3168 = vpow2.f32 %v1491_v34  ;;  %v1504_v26 = vadd.f32 1.0, %v3159_v47  ;;  %v1507_v19 = vmul.f32 -0.5, %v3159_v47  ;;  %v1510_v63 = vand.u32 2147483647, %v3159_v47 }
 0x53d   : > { %3170 = vlog2.f32 %v1495_v61  ;;  %v1499_v5 = vadd.f32 1.0, %v1498_v40  ;;  %vm4244_vm6 = vcmp.lt.f32.partialorder %v1501_v50, 0.0004427343 }
 0x53e   : > { %v3161_v45 = vpop.eup %3160  ;;  %3172 = vpow2.f32 %v1493_v7  ;;  %v1508_v16 = vadd.f32 1.0, %v1507_v19  ;;  %vm4256_vm11 = vcmp.lt.f32.partialorder %v1510_v63, 0.0004427343 }
 0x53f   : > { %v3163_v62 = vpop.eup %3162  ;;  %v1513_v31 = vadd.f32 1.0, %v3161_v45  ;;  %3174 = vlog2.f32 %v1504_v26  ;;  %v1516_v21 = vmul.f32 -0.5, %v3161_v45  ;;  %v1519_v46 = vand.u32 2147483647, %v3161_v45 }
 0x540   : > { %v1522_v42 = vadd.f32 1.0, %v3163_v62  ;;  %v1525_v0 = vmul.f32 -0.5, %v3163_v62  ;;  %v1500_v35 = vmul.f32 %v3157_v3, %v1499_v5  ;;  %v1528_v38 = vand.u32 2147483647, %v3163_v62 }
 0x541   : > { %3176 = vlog2.f32 %v1513_v31  ;;  %v1517_v6 = vadd.f32 1.0, %v1516_v21  ;;  %v1509_v58 = vmul.f32 %v3159_v47, %v1508_v16  ;;  %vm4263_vm12 = vcmp.lt.f32.partialorder %v1519_v46, 0.0004427343 }
 0x542   : > { %v3165_v20 = vpop.eup %3164  ;;  %3178 = vlog2.f32 %v1522_v42  ;;  %v1526_v22 = vadd.f32 1.0, %v1525_v0  ;;  %vm4268_vm13 = vcmp.lt.f32.partialorder %v1528_v38, 0.0004427343 }
 0x543   : > { %v4239_v43 = vpop.eup %3166  ;;  %v1531_v57 = vadd.f32 1.0, %v3165_v20  ;;  %v1534_v24 = vmul.f32 -0.5, %v3165_v20  ;;  %v1518_v37 = vmul.f32 %v3161_v45, %v1517_v6  ;;  %v1537_v36 = vand.u32 2147483647, %v3165_v20 }
 0x544   : > { %v1540_v52 = vadd.f32 1.0, %v4239_v43  ;;  %v1543_v15 = vmul.f32 -0.5, %v4239_v43  ;;  %v1527_v53 = vmul.f32 %v3163_v62, %v1526_v22  ;;  %v1546_v21 = vand.u32 2147483647, %v4239_v43 }
 0x545   : > { %3180 = vlog2.f32 %v1531_v57  ;;  %v1535_v39 = vadd.f32 1.0, %v1534_v24  ;;  %vm4277_vm14 = vcmp.lt.f32.partialorder %v1537_v36, 0.0004427343 }
 0x546   : > { %v4242_v14 = vpop.eup %3168  ;;  %3182 = vlog2.f32 %v1540_v52  ;;  %v1544_v7 = vadd.f32 1.0, %v1543_v15  ;;  %vm1547_vm15 = vcmp.lt.f32.partialorder %v1546_v21, 0.0004427343 }
 0x547   : > { %v3171_v12 = vpop.eup %3170  ;;  %v1549_v33 = vadd.f32 1.0, %v4242_v14  ;;  %v1552_v47 = vmul.f32 -0.5, %v4242_v14  ;;  %v1536_v0 = vmul.f32 %v3165_v20, %v1535_v39  ;;  %v1555_v5 = vand.u32 2147483647, %v4242_v14 }
 0x548   : > { %v4249_v23 = vpop.eup %3172  ;;  %v1497_v4 = vmul.f32 0.6931472, %v3171_v12  ;;  %v1545_v12 = vmul.f32 %v4239_v43, %v1544_v7 }
 0x549   : > { %3184 = vlog2.f32 %v1549_v33  ;;  %v1558_v18 = vadd.f32 1.0, %v4249_v23  ;;  %v3175_v32 = vpop.eup %3174  ;;  %v1561_v40 = vmul.f32 -0.5, %v4249_v23  ;;  %v1553_v6 = vadd.f32 1.0, %v1552_v47 }
 0x54a   : > { %v1503_v49 = vsel %vm4244_vm6, %v1500_v35, %v1497_v4  ;;  %v1506_v60 = vmul.f32 0.6931472, %v3175_v32  ;;  %v1564_v29 = vand.u32 2147483647, %v4249_v23  ;;  %vm1556_vm0 = vcmp.lt.f32.partialorder %v1555_v5, 0.0004427343 }
 0x54b   : > { %v3177_v2 = vpop.eup %3176  ;;  %3186 = vlog2.f32 %v1558_v18  ;;  %v1567_v26 = vmul.f32 0.01, %v1503_v49  ;;  %v1562_v33 = vadd.f32 1.0, %v1561_v40  ;;  %v1554_v38 = vmul.f32 %v4242_v14, %v1553_v6 }
 0x54c   : > { %v3179_v3 = vpop.eup %3178  ;;  %v1515_v34 = vmul.f32 0.6931472, %v3177_v2  ;;  %v1512_v45 = vsel %vm4256_vm11, %v1509_v58, %v1506_v60  ;;  %vm1565_vm1 = vcmp.lt.f32.partialorder %v1564_v29, 0.0004427343  ;;  %vm1478_vm6 = vcmp.gt.f32.partialorder %v4235_v10, 20.0 }
 0x54d   : > { %v1524_v31 = vmul.f32 0.6931472, %v3179_v3  ;;  %v1568_v19 = vmul.f32 0.01, %v1512_v45  ;;  %v1575_v59 = vsel %vm1471_vm7, %v4191_v41, %v1567_v26  ;;  %v1563_v54 = vmul.f32 %v4249_v23, %v1562_v33 }
 0x54e   : > { %v1521_v62 = vsel %vm4263_vm12, %v1518_v37, %v1515_v34 }
 0x54f   : > { %v3181_v50 = vpop.eup %3180  ;;  %v1569_v57 = vmul.f32 0.01, %v1521_v62  ;;  %v1530_v52 = vsel %vm4268_vm13, %v1527_v53, %v1524_v31  ;;  %v1576_v35 = vsel %vm1472_vm9, %v4193_v8, %v1568_v19  ;;  %v1601_v53 = vpop.permute.xlu1 %1600 }
 0x550   : > { %v3183_v16 = vpop.eup %3182  ;;  %v1533_v63 = vmul.f32 0.6931472, %v3181_v50  ;;  %v1570_v46 = vmul.f32 0.01, %v1530_v52 }
 0x551   : > { %v1577_v24 = vsel %vm1473_vm8, %v4202_v13, %v1569_v57  ;;  %v1542_v20 = vmul.f32 0.6931472, %v3183_v16 }
 0x552   : > { %v2943_v22 = vpack.c.bf16 %v1577_v24, %v1575_v59  ;;  %v1539_v4 = vsel %vm4277_vm14, %v1536_v0, %v1533_v63  ;;  %v1578_v43 = vsel %vm1474_vm10, %v4205_v11, %v1570_v46 }
 0x553   : > { %v3185_v9 = vpop.eup %3184  ;;  %v2941_v41 = vpack.c.bf16 %v1578_v43, %v1576_v35  ;;  %v1548_v15 = vsel %vm1547_vm15, %v1545_v12, %v1542_v20  ;;  %v1571_v27 = vmul.f32 0.01, %v1539_v4  ;;  %v1611_v6 = vpop.permute.xlu1 %1610 }
 0x554   : > { %v1551_v13 = vmul.f32 0.6931472, %v3185_v9  ;;  %v1572_v11 = vmul.f32 0.01, %v1548_v15 }
 0x555   : > { %v3187_v58 = vpop.eup %3186  ;;  %2942 = vmatprep.subr.bf16.mxu1 %v2941_v41  ;;  %v1579_v14 = vsel %vm1475_vm3, %v4214_v44, %v1571_v27  ;;  %v2855_v44 = vld [vmem:[%s4924_s3 + $0x88] sm:$0xff] }
 0x556   : > { %v1557_v18 = vsel %vm1556_vm0, %v1554_v38, %v1551_v13  ;;  %2944 = vmatpush1.bf16.msra.mxu1 %v2943_v22  ;;  %v1560_v8 = vmul.f32 0.6931472, %v3187_v58  ;;  %v1580_v23 = vsel %vm1476_vm5, %v4217_v55, %v1572_v11  ;;  %v2856_v55 = vld [vmem:[%s4924_s3 + $0x90] sm:$0xff] }
 0x557   : > { %v1573_v28 = vmul.f32 0.01, %v1557_v18 }
 0x558   : > { %v1566_v32 = vsel %vm1565_vm1, %v1563_v54, %v1560_v8 }
 0x559   : > { %v1581_v49 = vsel %vm1477_vm4, %v4226_v30, %v1573_v28  ;;  %v1574_v37 = vmul.f32 0.01, %v1566_v32  ;;  %v1596_v30 = vpop.permute.xlu0 %1595 }
 0x55a   : > { %v2947_v25 = vpack.c.bf16 %v1581_v49, %v1579_v14 }
 0x55b   : > { %v1582_v36 = vsel %vm1478_vm6, %v4229_v17, %v1574_v37 }
 0x55c   : > { %v2945_v2 = vpack.c.bf16 %v1582_v36, %v1580_v23 }
 0x55d   : > { %v1606_v62 = vpop.permute.xlu0 %1605 }
 0x55e   : > { %2946 = vmatprep.subr.bf16.mxu1 %v2945_v2 }
 0x55f   : > { %2948 = vmatpush1.bf16.msra.mxu1 %v2947_v25 }
 0x562   : > { %2862 = vmatmul.mubr.msk.f32.vlgmr.msra.gmra.mrb[20].mxu1 %vm576_vm2, %v2854_v51 }
 0x563   : > { %1695 = vmatprep.mubr.f32.mxu1 %v3380_v1 }
 0x566   : > { %2863 = vmatmul.mubr.msk.f32.gmra.mrb[22].mxu1 %vm576_vm2, %v2855_v44 }
 0x567   : > { %1701 = vmatprep.mubr.f32.mxu1 %v3380_v1 }
 0x56a   : > { %2864 = vmatmul.mubr.msk.f32.gmra.mrb[24].mxu1 %vm576_vm2, %v2856_v55 }
 0x56b   : > { %1707 = vmatprep.mubr.f32.mxu1 %v3380_v1 }
 0x56e   : > { %2865 = vmatmul.mubr.msk.f32.gmra.mrb[26].mxu1 %vm576_vm2, %v2857_v48 }
 0x56f   : > { %2207 = vmatprep.mubr.f32.mxu1 %v3380_v1 }
 0x635   : > { %v1691_v17 = vpop.f32.mrb[20].mxu1 }
 0x636   : > { %v4331_v56 = vadd.f32 %v1691_v17, %v1596_v30  ;;  %v1693_v10 = vpop.f32.mrb[21].mxu1 }
 0x637   : > { %v4333_v39 = vadd.f32 %v1693_v10, %v1596_v30 }
 0x638   : > { %v4336_v60 = vmul.f32 100.0, %v4331_v56 }
 0x639   : > { %v4339_v3 = vmul.f32 100.0, %v4333_v39  ;;  %v1697_v34 = vpop.f32.mrb[22].mxu1 }
 0x63a   : > { %v1722_v47 = vmin.f32 %v4336_v60, 20.0  ;;  %v4342_v61 = vadd.f32 %v1697_v34, %v1601_v53  ;;  %v1699_v7 = vpop.f32.mrb[23].mxu1  ;;  %vm1730_vm8 = vcmp.gt.f32.partialorder %v4336_v60, 20.0 }
 0x63b   : > { %v1723_v26 = vmin.f32 %v4339_v3, 20.0  ;;  %v4345_v45 = vadd.f32 %v1699_v7, %v1601_v53  ;;  %vm1731_vm10 = vcmp.gt.f32.partialorder %v4339_v3, 20.0 }
 0x63c   : > { %v1738_v31 = vmul.f32 1.442695, %v1722_v47  ;;  %v4348_v40 = vmul.f32 100.0, %v4342_v61 }
 0x63d   : > { %v1740_v42 = vmul.f32 1.442695, %v1723_v26  ;;  %v4351_v19 = vmul.f32 100.0, %v4345_v45  ;;  %v1703_v21 = vpop.f32.mrb[24].mxu1 }
 0x63e   : > { %3188 = vpow2.f32 %v1738_v31  ;;  %v1724_v50 = vmin.f32 %v4348_v40, 20.0  ;;  %v4354_v57 = vadd.f32 %v1703_v21, %v1606_v62  ;;  %v1705_v0 = vpop.f32.mrb[25].mxu1  ;;  %vm1732_vm9 = vcmp.gt.f32.partialorder %v4348_v40, 20.0 }
 0x63f   : > { %3190 = vpow2.f32 %v1740_v42  ;;  %v1725_v5 = vmin.f32 %v4351_v19, 20.0  ;;  %v4357_v52 = vadd.f32 %v1705_v0, %v1606_v62  ;;  %vm1733_vm11 = vcmp.gt.f32.partialorder %v4351_v19, 20.0 }
 0x640   : > { %v1742_v16 = vmul.f32 1.442695, %v1724_v50  ;;  %v4360_v63 = vmul.f32 100.0, %v4354_v57 }
 0x641   : > { %v1744_v46 = vmul.f32 1.442695, %v1725_v5  ;;  %v4363_v12 = vmul.f32 100.0, %v4357_v52  ;;  %v1709_v59 = vpop.f32.mrb[26].mxu1 }
 0x642   : > { %3192 = vpow2.f32 %v1742_v16  ;;  %v1726_v24 = vmin.f32 %v4360_v63, 20.0  ;;  %v4366_v20 = vadd.f32 %v1709_v59, %v1611_v6  ;;  %v1711_v33 = vpop.f32.mrb[27].mxu1  ;;  %vm1734_vm4 = vcmp.gt.f32.partialorder %v4360_v63, 20.0  ;;  %v2866_v63 = vld [vmem:[%s4924_s3 + $0xa0] sm:$0xff] }
 0x643   : > { %3194 = vpow2.f32 %v1744_v46  ;;  %v1727_v22 = vmin.f32 %v4363_v12, 20.0  ;;  %v4369_v4 = vadd.f32 %v1711_v33, %v1611_v6  ;;  %vm1735_vm6 = vcmp.gt.f32.partialorder %v4363_v12, 20.0  ;;  %v2869_v12 = vld [vmem:[%s4924_s3 + $0xb8] sm:$0xff] }
 0x644   : > { %v1746_v35 = vmul.f32 1.442695, %v1726_v24  ;;  %v4372_v43 = vmul.f32 100.0, %v4366_v20 }
 0x645   : > { %v1748_v9 = vmul.f32 1.442695, %v1727_v22  ;;  %v4375_v41 = vmul.f32 100.0, %v4369_v4 }
 0x646   : > { %3196 = vpow2.f32 %v1746_v35  ;;  %v1728_v29 = vmin.f32 %v4372_v43, 20.0  ;;  %vm1736_vm5 = vcmp.gt.f32.partialorder %v4372_v43, 20.0 }
 0x647   : > { %3198 = vpow2.f32 %v1748_v9  ;;  %v1729_v13 = vmin.f32 %v4375_v41, 20.0 }
 0x648   : > { %v3189_v38 = vpop.eup %3188  ;;  %v1750_v15 = vmul.f32 1.442695, %v1728_v29 }
 0x649   : > { %v3191_v58 = vpop.eup %3190  ;;  %v1754_v27 = vadd.f32 1.0, %v3189_v38  ;;  %v1752_v18 = vmul.f32 1.442695, %v1729_v13  ;;  %v1757_v32 = vmul.f32 -0.5, %v3189_v38  ;;  %v1760_v36 = vand.u32 2147483647, %v3189_v38 }
 0x64a   : > { %3200 = vpow2.f32 %v1750_v15  ;;  %v1763_v8 = vadd.f32 1.0, %v3191_v58  ;;  %v1766_v49 = vmul.f32 -0.5, %v3191_v58  ;;  %v1769_v30 = vand.u32 2147483647, %v3191_v58 }
 0x64b   : > { %3202 = vlog2.f32 %v1754_v27  ;;  %v1758_v44 = vadd.f32 1.0, %v1757_v32  ;;  %vm4384_vm7 = vcmp.lt.f32.partialorder %v1760_v36, 0.0004427343 }
 0x64c   : > { %v3193_v54 = vpop.eup %3192  ;;  %3204 = vpow2.f32 %v1752_v18  ;;  %v1767_v48 = vadd.f32 1.0, %v1766_v49  ;;  %vm4396_vm12 = vcmp.lt.f32.partialorder %v1769_v30, 0.0004427343 }
 0x64d   : > { %v3195_v28 = vpop.eup %3194  ;;  %v1772_v11 = vadd.f32 1.0, %v3193_v54  ;;  %3206 = vlog2.f32 %v1763_v8  ;;  %v1775_v25 = vmul.f32 -0.5, %v3193_v54  ;;  %v1778_v53 = vand.u32 2147483647, %v3193_v54 }
 0x64e   : > { %v1781_v14 = vadd.f32 1.0, %v3195_v28  ;;  %v1784_v51 = vmul.f32 -0.5, %v3195_v28  ;;  %v1759_v21 = vmul.f32 %v3189_v38, %v1758_v44  ;;  %v1787_v50 = vand.u32 2147483647, %v3195_v28 }
 0x64f   : > { %3208 = vlog2.f32 %v1772_v11  ;;  %v1776_v10 = vadd.f32 1.0, %v1775_v25  ;;  %v1768_v5 = vmul.f32 %v3191_v58, %v1767_v48  ;;  %vm4403_vm13 = vcmp.lt.f32.partialorder %v1778_v53, 0.0004427343 }
 0x650   : > { %v3197_v37 = vpop.eup %3196  ;;  %3210 = vlog2.f32 %v1781_v14  ;;  %v1785_v31 = vadd.f32 1.0, %v1784_v51  ;;  %vm4408_vm14 = vcmp.lt.f32.partialorder %v1787_v50, 0.0004427343 }
 0x651   : > { %v4379_v23 = vpop.eup %3198  ;;  %v1790_v2 = vadd.f32 1.0, %v3197_v37  ;;  %v1793_v7 = vmul.f32 -0.5, %v3197_v37  ;;  %v1777_v24 = vmul.f32 %v3193_v54, %v1776_v10  ;;  %v1796_v22 = vand.u32 2147483647, %v3197_v37 }
 0x652   : > { %v1799_v55 = vadd.f32 1.0, %v4379_v23  ;;  %v1802_v0 = vmul.f32 -0.5, %v4379_v23  ;;  %v1786_v13 = vmul.f32 %v3195_v28, %v1785_v31  ;;  %v1805_v25 = vand.u32 2147483647, %v4379_v23 }
 0x653   : > { %3212 = vlog2.f32 %v1790_v2  ;;  %v1794_v9 = vadd.f32 1.0, %v1793_v7  ;;  %vm4417_vm15 = vcmp.lt.f32.partialorder %v1796_v22, 0.0004427343 }
 0x654   : > { %v4382_v17 = vpop.eup %3200  ;;  %3214 = vlog2.f32 %v1799_v55  ;;  %v1803_v18 = vadd.f32 1.0, %v1802_v0  ;;  %vm1806_vm0 = vcmp.lt.f32.partialorder %v1805_v25, 0.0004427343 }
 0x655   : > { %v3203_v34 = vpop.eup %3202  ;;  %v1808_v26 = vadd.f32 1.0, %v4382_v17  ;;  %v1811_v58 = vmul.f32 -0.5, %v4382_v17  ;;  %v1795_v51 = vmul.f32 %v3197_v37, %v1794_v9  ;;  %v1814_v44 = vand.u32 2147483647, %v4382_v17 }
 0x656   : > { %v4389_v62 = vpop.eup %3204  ;;  %v1756_v42 = vmul.f32 0.6931472, %v3203_v34  ;;  %v1804_v34 = vmul.f32 %v4379_v23, %v1803_v18 }
 0x657   : > { %3216 = vlog2.f32 %v1808_v26  ;;  %v1817_v6 = vadd.f32 1.0, %v4389_v62  ;;  %v3207_v46 = vpop.eup %3206  ;;  %v1820_v32 = vmul.f32 -0.5, %v4389_v62  ;;  %v1812_v10 = vadd.f32 1.0, %v1811_v58 }
 0x658   : > { %v1762_v59 = vsel %vm4384_vm7, %v1759_v21, %v1756_v42  ;;  %v1765_v29 = vmul.f32 0.6931472, %v3207_v46  ;;  %v1823_v40 = vand.u32 2147483647, %v4389_v62  ;;  %vm1815_vm1 = vcmp.lt.f32.partialorder %v1814_v44, 0.0004427343 }
 0x659   : > { %v3209_v35 = vpop.eup %3208  ;;  %3218 = vlog2.f32 %v1817_v6  ;;  %v1826_v8 = vmul.f32 0.01, %v1762_v59  ;;  %v1821_v26 = vadd.f32 1.0, %v1820_v32  ;;  %v1813_v50 = vmul.f32 %v4382_v17, %v1812_v10 }
 0x65a   : > { %v3211_v38 = vpop.eup %3210  ;;  %v1774_v15 = vmul.f32 0.6931472, %v3209_v35  ;;  %v1771_v54 = vsel %vm4396_vm12, %v1768_v5, %v1765_v29  ;;  %vm1824_vm3 = vcmp.lt.f32.partialorder %v1823_v40, 0.0004427343  ;;  %vm1737_vm7 = vcmp.gt.f32.partialorder %v4375_v41, 20.0 }
 0x65b   : > { %v1783_v11 = vmul.f32 0.6931472, %v3211_v38  ;;  %v1827_v49 = vmul.f32 0.01, %v1771_v54  ;;  %v1834_v47 = vsel %vm1730_vm8, %v4331_v56, %v1826_v8  ;;  %v1822_v3 = vmul.f32 %v4389_v62, %v1821_v26 }
 0x65c   : > { %v1780_v28 = vsel %vm4403_vm13, %v1777_v24, %v1774_v15 }
 0x65d   : > { %v3213_v36 = vpop.eup %3212  ;;  %v1828_v2 = vmul.f32 0.01, %v1780_v28  ;;  %v1789_v55 = vsel %vm4408_vm14, %v1786_v13, %v1783_v11  ;;  %v1835_v21 = vsel %vm1731_vm10, %v4333_v39, %v1827_v49  ;;  %v1860_v13 = vpop.permute.xlu1 %1859 }
 0x65e   : > { %v3215_v48 = vpop.eup %3214  ;;  %v1792_v30 = vmul.f32 0.6931472, %v3213_v36  ;;  %v1829_v53 = vmul.f32 0.01, %v1789_v55 }
 0x65f   : > { %v1836_v7 = vsel %vm1732_vm9, %v4342_v61, %v1828_v2  ;;  %v1801_v37 = vmul.f32 0.6931472, %v3215_v48 }
 0x660   : > { %v2951_v31 = vpack.c.bf16 %v1836_v7, %v1834_v47  ;;  %v1798_v42 = vsel %vm4417_vm15, %v1795_v51, %v1792_v30  ;;  %v1837_v23 = vsel %vm1733_vm11, %v4345_v45, %v1829_v53 }
 0x661   : > { %v3217_v60 = vpop.eup %3216  ;;  %v2949_v56 = vpack.c.bf16 %v1837_v23, %v1835_v21  ;;  %v1807_v0 = vsel %vm1806_vm0, %v1804_v34, %v1801_v37  ;;  %v1830_v16 = vmul.f32 0.01, %v1798_v42  ;;  %v1870_v10 = vpop.permute.xlu1 %1869 }
 0x662   : > { %v1810_v61 = vmul.f32 0.6931472, %v3217_v60  ;;  %v1831_v45 = vmul.f32 0.01, %v1807_v0 }
 0x663   : > { %v3219_v5 = vpop.eup %3218  ;;  %2950 = vmatprep.subr.bf16.mxu0 %v2949_v56  ;;  %v1838_v17 = vsel %vm1734_vm4, %v4354_v57, %v1830_v16  ;;  %v2867_v57 = vld [vmem:[%s4924_s3 + $0xa8] sm:$0xff] }
 0x664   : > { %v1816_v6 = vsel %vm1815_vm1, %v1813_v50, %v1810_v61  ;;  %2952 = vmatpush1.bf16.msra.mxu0 %v2951_v31  ;;  %v1819_v39 = vmul.f32 0.6931472, %v3219_v5  ;;  %v1839_v62 = vsel %vm1735_vm6, %v4357_v52, %v1831_v45  ;;  %v2868_v52 = vld [vmem:[%s4924_s3 + $0xb0] sm:$0xff] }
 0x665   : > { %v1832_v19 = vmul.f32 0.01, %v1816_v6 }
 0x666   : > { %v1825_v46 = vsel %vm1824_vm3, %v1822_v3, %v1819_v39 }
 0x667   : > { %v1840_v59 = vsel %vm1736_vm5, %v4366_v20, %v1832_v19  ;;  %v1833_v24 = vmul.f32 0.01, %v1825_v46  ;;  %v1855_v20 = vpop.permute.xlu0 %1854 }
 0x668   : > { %v2955_v33 = vpack.c.bf16 %v1840_v59, %v1838_v17 }
 0x669   : > { %v1841_v22 = vsel %vm1737_vm7, %v4369_v4, %v1833_v24 }
 0x66a   : > { %v2953_v35 = vpack.c.bf16 %v1841_v22, %v1839_v62 }
 0x66b   : > { %v1865_v28 = vpop.permute.xlu0 %1864 }
 0x66c   : > { %2954 = vmatprep.subr.bf16.mxu0 %v2953_v35 }
 0x66d   : > { %2956 = vmatpush1.bf16.msra.mxu0 %v2955_v33 }
 0x670   : > { %2874 = vmatmul.mubr.msk.f32.vlgmr.msra.gmra.mrb[20].mxu0 %vm576_vm2, %v2866_v63 }
 0x671   : > { %1954 = vmatprep.mubr.f32.mxu0 %v3380_v1 }
 0x674   : > { %2875 = vmatmul.mubr.msk.f32.gmra.mrb[22].mxu0 %vm576_vm2, %v2867_v57 }
 0x675   : > { %1960 = vmatprep.mubr.f32.mxu0 %v3380_v1 }
 0x678   : > { %2876 = vmatmul.mubr.msk.f32.gmra.mrb[24].mxu0 %vm576_vm2, %v2868_v52 }
 0x679   : > { %1966 = vmatprep.mubr.f32.mxu0 %v3380_v1 }
 0x67c   : > { %2877 = vmatmul.mubr.msk.f32.gmra.mrb[26].mxu0 %vm576_vm2, %v2869_v12 }
 0x67d   : > { %2466 = vmatprep.mubr.f32.mxu0 %v3380_v1 }
 0x743   : > { %v1950_v4 = vpop.f32.mrb[20].mxu0 }
 0x744   : > { %v4471_v43 = vadd.f32 %v1950_v4, %v1855_v20  ;;  %v1952_v41 = vpop.f32.mrb[21].mxu0 }
 0x745   : > { %v4473_v9 = vadd.f32 %v1952_v41, %v1855_v20 }
 0x746   : > { %v4476_v29 = vmul.f32 100.0, %v4471_v43 }
 0x747   : > { %v4479_v38 = vmul.f32 100.0, %v4473_v9  ;;  %v1956_v15 = vpop.f32.mrb[22].mxu0 }
 0x748   : > { %v1981_v58 = vmin.f32 %v4476_v29, 20.0  ;;  %v4482_v27 = vadd.f32 %v1956_v15, %v1860_v13  ;;  %v1958_v18 = vpop.f32.mrb[23].mxu0  ;;  %vm1989_vm9 = vcmp.gt.f32.partialorder %v4476_v29, 20.0 }
 0x749   : > { %v1982_v8 = vmin.f32 %v4479_v38, 20.0  ;;  %v4485_v54 = vadd.f32 %v1958_v18, %v1860_v13  ;;  %vm1990_vm11 = vcmp.gt.f32.partialorder %v4479_v38, 20.0 }
 0x74a   : > { %v1997_v11 = vmul.f32 1.442695, %v1981_v58  ;;  %v4488_v32 = vmul.f32 100.0, %v4482_v27 }
 0x74b   : > { %v1999_v14 = vmul.f32 1.442695, %v1982_v8  ;;  %v4491_v49 = vmul.f32 100.0, %v4485_v54  ;;  %v1962_v25 = vpop.f32.mrb[24].mxu0 }
 0x74c   : > { %3220 = vpow2.f32 %v1997_v11  ;;  %v1983_v36 = vmin.f32 %v4488_v32, 20.0  ;;  %v4494_v2 = vadd.f32 %v1962_v25, %v1865_v28  ;;  %v1964_v51 = vpop.f32.mrb[25].mxu0  ;;  %vm1991_vm10 = vcmp.gt.f32.partialorder %v4488_v32, 20.0 }
 0x74d   : > { %3222 = vpow2.f32 %v1999_v14  ;;  %v1984_v44 = vmin.f32 %v4491_v49, 20.0  ;;  %v4497_v55 = vadd.f32 %v1964_v51, %v1865_v28  ;;  %vm1992_vm12 = vcmp.gt.f32.partialorder %v4491_v49, 20.0 }
 0x74e   : > { %v2001_v48 = vmul.f32 1.442695, %v1983_v36  ;;  %v4500_v30 = vmul.f32 100.0, %v4494_v2 }
 0x74f   : > { %v2003_v53 = vmul.f32 1.442695, %v1984_v44  ;;  %v4503_v34 = vmul.f32 100.0, %v4497_v55  ;;  %v1968_v47 = vpop.f32.mrb[26].mxu0 }
 0x750   : > { %3224 = vpow2.f32 %v2001_v48  ;;  %v1985_v7 = vmin.f32 %v4500_v30, 20.0  ;;  %v4506_v37 = vadd.f32 %v1968_v47, %v1870_v10  ;;  %v1970_v26 = vpop.f32.mrb[27].mxu0  ;;  %vm1993_vm5 = vcmp.gt.f32.partialorder %v4500_v30, 20.0  ;;  %v2878_v30 = vld [vmem:[%s4924_s3 + $0xc0] sm:$0xff] }
 0x751   : > { %3226 = vpow2.f32 %v2003_v53  ;;  %v1986_v31 = vmin.f32 %v4503_v34, 20.0  ;;  %v4509_v42 = vadd.f32 %v1970_v26, %v1870_v10  ;;  %vm1994_vm7 = vcmp.gt.f32.partialorder %v4503_v34, 20.0  ;;  %v2881_v34 = vld [vmem:[%s4924_s3 + $0xd8] sm:$0xff] }
 0x752   : > { %v2005_v21 = vmul.f32 1.442695, %v1985_v7  ;;  %v4512_v23 = vmul.f32 100.0, %v4506_v37 }
 0x753   : > { %v2007_v60 = vmul.f32 1.442695, %v1986_v31  ;;  %v4515_v56 = vmul.f32 100.0, %v4509_v42 }
 0x754   : > { %3228 = vpow2.f32 %v2005_v21  ;;  %v1987_v40 = vmin.f32 %v4512_v23, 20.0  ;;  %vm1995_vm6 = vcmp.gt.f32.partialorder %v4512_v23, 20.0 }
 0x755   : > { %3230 = vpow2.f32 %v2007_v60  ;;  %v1988_v61 = vmin.f32 %v4515_v56, 20.0 }
 0x756   : > { %v3221_v50 = vpop.eup %3220  ;;  %v2009_v0 = vmul.f32 1.442695, %v1987_v40 }
 0x757   : > { %v3223_v5 = vpop.eup %3222  ;;  %v2013_v16 = vadd.f32 1.0, %v3221_v50  ;;  %v2011_v6 = vmul.f32 1.442695, %v1988_v61  ;;  %v2016_v46 = vmul.f32 -0.5, %v3221_v50  ;;  %v2019_v22 = vand.u32 2147483647, %v3221_v50 }
 0x758   : > { %3232 = vpow2.f32 %v2009_v0  ;;  %v2022_v39 = vadd.f32 1.0, %v3223_v5  ;;  %v2025_v59 = vmul.f32 -0.5, %v3223_v5  ;;  %v2028_v20 = vand.u32 2147483647, %v3223_v5 }
 0x759   : > { %3234 = vlog2.f32 %v2013_v16  ;;  %v2017_v57 = vadd.f32 1.0, %v2016_v46  ;;  %vm4524_vm8 = vcmp.lt.f32.partialorder %v2019_v22, 0.0004427343 }
 0x75a   : > { %v3225_v3 = vpop.eup %3224  ;;  %3236 = vpow2.f32 %v2011_v6  ;;  %v2026_v12 = vadd.f32 1.0, %v2025_v59  ;;  %vm4536_vm13 = vcmp.lt.f32.partialorder %v2028_v20, 0.0004427343 }
 0x75b   : > { %v3227_v19 = vpop.eup %3226  ;;  %v2031_v45 = vadd.f32 1.0, %v3225_v3  ;;  %3238 = vlog2.f32 %v2022_v39  ;;  %v2034_v33 = vmul.f32 -0.5, %v3225_v3  ;;  %v2037_v13 = vand.u32 2147483647, %v3225_v3 }
 0x75c   : > { %v2040_v17 = vadd.f32 1.0, %v3227_v19  ;;  %v2043_v63 = vmul.f32 -0.5, %v3227_v19  ;;  %v2018_v25 = vmul.f32 %v3221_v50, %v2017_v57  ;;  %v2046_v36 = vand.u32 2147483647, %v3227_v19 }
 0x75d   : > { %3240 = vlog2.f32 %v2031_v45  ;;  %v2035_v41 = vadd.f32 1.0, %v2034_v33  ;;  %v2027_v44 = vmul.f32 %v3223_v5, %v2026_v12  ;;  %vm4543_vm14 = vcmp.lt.f32.partialorder %v2037_v13, 0.0004427343 }
 0x75e   : > { %v3229_v24 = vpop.eup %3228  ;;  %3242 = vlog2.f32 %v2040_v17  ;;  %v2044_v11 = vadd.f32 1.0, %v2043_v63  ;;  %vm4548_vm15 = vcmp.lt.f32.partialorder %v2046_v36, 0.0004427343 }
 0x75f   : > { %v4519_v62 = vpop.eup %3230  ;;  %v2049_v35 = vadd.f32 1.0, %v3229_v24  ;;  %v2052_v18 = vmul.f32 -0.5, %v3229_v24  ;;  %v2036_v7 = vmul.f32 %v3225_v3, %v2035_v41  ;;  %v2055_v31 = vand.u32 2147483647, %v3229_v24 }
 0x760   : > { %v2058_v52 = vadd.f32 1.0, %v4519_v62  ;;  %v2061_v51 = vmul.f32 -0.5, %v4519_v62  ;;  %v2045_v61 = vmul.f32 %v3227_v19, %v2044_v11  ;;  %v2064_v33 = vand.u32 2147483647, %v4519_v62 }
 0x761   : > { %3244 = vlog2.f32 %v2049_v35  ;;  %v2053_v60 = vadd.f32 1.0, %v2052_v18  ;;  %vm4557_vm0 = vcmp.lt.f32.partialorder %v2055_v31, 0.0004427343 }
 0x762   : > { %v4522_v4 = vpop.eup %3232  ;;  %3246 = vlog2.f32 %v2058_v52  ;;  %v2062_v6 = vadd.f32 1.0, %v2061_v51  ;;  %vm2065_vm1 = vcmp.lt.f32.partialorder %v2064_v33, 0.0004427343 }
 0x763   : > { %v3235_v15 = vpop.eup %3234  ;;  %v2067_v8 = vadd.f32 1.0, %v4522_v4  ;;  %v2070_v5 = vmul.f32 -0.5, %v4522_v4  ;;  %v2054_v63 = vmul.f32 %v3229_v24, %v2053_v60  ;;  %v2073_v57 = vand.u32 2147483647, %v4522_v4 }
 0x764   : > { %v4529_v28 = vpop.eup %3236  ;;  %v2015_v14 = vmul.f32 0.6931472, %v3235_v15  ;;  %v2063_v15 = vmul.f32 %v4519_v62, %v2062_v6 }
 0x765   : > { %3248 = vlog2.f32 %v2067_v8  ;;  %v2076_v10 = vadd.f32 1.0, %v4529_v28  ;;  %v3239_v53 = vpop.eup %3238  ;;  %v2079_v46 = vmul.f32 -0.5, %v4529_v28  ;;  %v2071_v41 = vadd.f32 1.0, %v2070_v5 }
 0x766   : > { %v2021_v47 = vsel %vm4524_vm8, %v2018_v25, %v2015_v14  ;;  %v2024_v40 = vmul.f32 0.6931472, %v3239_v53  ;;  %v2082_v32 = vand.u32 2147483647, %v4529_v28  ;;  %vm2074_vm3 = vcmp.lt.f32.partialorder %v2073_v57, 0.0004427343 }
 0x767   : > { %v3241_v21 = vpop.eup %3240  ;;  %3250 = vlog2.f32 %v2076_v10  ;;  %v2085_v39 = vmul.f32 0.01, %v2021_v47  ;;  %v2080_v8 = vadd.f32 1.0, %v2079_v46  ;;  %v2072_v36 = vmul.f32 %v4522_v4, %v2071_v41 }
 0x768   : > { %v3243_v50 = vpop.eup %3242  ;;  %v2033_v0 = vmul.f32 0.6931472, %v3241_v21  ;;  %v2030_v3 = vsel %vm4536_vm13, %v2027_v44, %v2024_v40  ;;  %vm2083_vm4 = vcmp.lt.f32.partialorder %v2082_v32, 0.0004427343  ;;  %vm1996_vm8 = vcmp.gt.f32.partialorder %v4515_v56, 20.0 }
 0x769   : > { %v2042_v45 = vmul.f32 0.6931472, %v3243_v50  ;;  %v2086_v59 = vmul.f32 0.01, %v2030_v3  ;;  %v2093_v58 = vsel %vm1989_vm9, %v4471_v43, %v2085_v39  ;;  %v2081_v38 = vmul.f32 %v4529_v28, %v2080_v8 }
 0x76a   : > { %v2039_v19 = vsel %vm4543_vm14, %v2036_v7, %v2033_v0 }
 0x76b   : > { %v3245_v22 = vpop.eup %3244  ;;  %v2087_v35 = vmul.f32 0.01, %v2039_v19  ;;  %v2048_v52 = vsel %vm4548_vm15, %v2045_v61, %v2042_v45  ;;  %v2094_v25 = vsel %vm1990_vm11, %v4473_v9, %v2086_v59  ;;  %v2119_v61 = vpop.permute.xlu1 %2118 }
 0x76c   : > { %v3247_v12 = vpop.eup %3246  ;;  %v2051_v20 = vmul.f32 0.6931472, %v3245_v22  ;;  %v2088_v13 = vmul.f32 0.01, %v2048_v52 }
 0x76d   : > { %v2095_v18 = vsel %vm1991_vm10, %v4482_v27, %v2087_v35  ;;  %v2060_v24 = vmul.f32 0.6931472, %v3247_v12 }
 0x76e   : > { %v2959_v11 = vpack.c.bf16 %v2095_v18, %v2093_v58  ;;  %v2057_v14 = vsel %vm4557_vm0, %v2054_v63, %v2051_v20  ;;  %v2096_v62 = vsel %vm1992_vm12, %v4485_v54, %v2088_v13 }
 0x76f   : > { %v3249_v29 = vpop.eup %3248  ;;  %v2957_v43 = vpack.c.bf16 %v2096_v62, %v2094_v25  ;;  %v2066_v51 = vsel %vm2065_vm1, %v2063_v15, %v2060_v24  ;;  %v2089_v48 = vmul.f32 0.01, %v2057_v14  ;;  %v2129_v41 = vpop.permute.xlu1 %2128 }
 0x770   : > { %v2069_v27 = vmul.f32 0.6931472, %v3249_v29  ;;  %v2090_v54 = vmul.f32 0.01, %v2066_v51 }
 0x771   : > { %v3251_v44 = vpop.eup %3250  ;;  %2958 = vmatprep.subr.bf16.mxu1 %v2957_v43  ;;  %v2097_v4 = vsel %vm1993_vm5, %v4494_v2, %v2089_v48  ;;  %v2879_v2 = vld [vmem:[%s4924_s3 + $0xc8] sm:$0xff] }
 0x772   : > { %v2075_v10 = vsel %vm2074_vm3, %v2072_v36, %v2069_v27  ;;  %2960 = vmatpush1.bf16.msra.mxu1 %v2959_v11  ;;  %v2078_v9 = vmul.f32 0.6931472, %v3251_v44  ;;  %v2098_v28 = vsel %vm1994_vm7, %v4497_v55, %v2090_v54  ;;  %v2880_v55 = vld [vmem:[%s4924_s3 + $0xd0] sm:$0xff] }
 0x773   : > { %v2091_v49 = vmul.f32 0.01, %v2075_v10 }
 0x774   : > { %v2084_v53 = vsel %vm2083_vm4, %v2081_v38, %v2078_v9 }
 0x775   : > { %v2099_v47 = vsel %vm1995_vm6, %v4506_v37, %v2091_v49  ;;  %v2092_v7 = vmul.f32 0.01, %v2084_v53  ;;  %v2114_v37 = vpop.permute.xlu0 %2113 }
 0x776   : > { %v2963_v26 = vpack.c.bf16 %v2099_v47, %v2097_v4 }
 0x777   : > { %v2100_v31 = vsel %vm1996_vm8, %v4509_v42, %v2092_v7 }
 0x778   : > { %v2961_v21 = vpack.c.bf16 %v2100_v31, %v2098_v28 }
 0x779   : > { %v2124_v19 = vpop.permute.xlu0 %2123 }
 0x77a   : > { %2962 = vmatprep.subr.bf16.mxu1 %v2961_v21 }
 0x77b   : > { %2964 = vmatpush1.bf16.msra.mxu1 %v2963_v26 }
 0x77e   : > { %2886 = vmatmul.mubr.msk.f32.vlgmr.msra.gmra.mrb[28].mxu1 %vm576_vm2, %v2878_v30 }
 0x77f   : > { %2213 = vmatprep.mubr.f32.mxu1 %v3380_v1 }
 0x782   : > { %2887 = vmatmul.mubr.msk.f32.gmra.mrb[30].mxu1 %vm576_vm2, %v2879_v2 }
 0x783   : > { %2219 = vmatprep.mubr.f32.mxu1 %v3380_v1 }
 0x786   : > { %2888 = vmatmul.mubr.msk.f32.gmra.mrb[32].mxu1 %vm576_vm2, %v2880_v55 }
 0x787   : > { %2225 = vmatprep.mubr.f32.mxu1 %v3380_v1 }
 0x78a   : > { %2889 = vmatmul.mubr.msk.f32.gmra.mrb[34].mxu1 %vm576_vm2, %v2881_v34 }
 0x78b   : > { %2697 = vmatprep.mubr.f32.mxu1 %v3380_v1 }
 0x851   : > { %v2209_v42 = vpop.f32.mrb[28].mxu1 }
 0x852   : > { %v4611_v23 = vadd.f32 %v2209_v42, %v2114_v37  ;;  %v2211_v56 = vpop.f32.mrb[29].mxu1 }
 0x853   : > { %v4613_v60 = vadd.f32 %v2211_v56, %v2114_v37 }
 0x854   : > { %v4616_v40 = vmul.f32 100.0, %v4611_v23 }
 0x855   : > { %v4619_v50 = vmul.f32 100.0, %v4613_v60  ;;  %v2215_v0 = vpop.f32.mrb[30].mxu1 }
 0x856   : > { %v2240_v5 = vmin.f32 %v4616_v40, 20.0  ;;  %v4622_v16 = vadd.f32 %v2215_v0, %v2119_v61  ;;  %v2217_v6 = vpop.f32.mrb[31].mxu1  ;;  %vm2248_vm10 = vcmp.gt.f32.partialorder %v4616_v40, 20.0 }
 0x857   : > { %v2241_v39 = vmin.f32 %v4619_v50, 20.0  ;;  %v4625_v3 = vadd.f32 %v2217_v6, %v2119_v61  ;;  %vm2249_vm12 = vcmp.gt.f32.partialorder %v4619_v50, 20.0 }
 0x858   : > { %v2256_v45 = vmul.f32 1.442695, %v2240_v5  ;;  %v4628_v46 = vmul.f32 100.0, %v4622_v16 }
 0x859   : > { %v2258_v17 = vmul.f32 1.442695, %v2241_v39  ;;  %v4631_v59 = vmul.f32 100.0, %v4625_v3  ;;  %v2221_v33 = vpop.f32.mrb[32].mxu1 }
 0x85a   : > { %3252 = vpow2.f32 %v2256_v45  ;;  %v2242_v22 = vmin.f32 %v4628_v46, 20.0  ;;  %v4634_v35 = vadd.f32 %v2221_v33, %v2124_v19  ;;  %v2223_v63 = vpop.f32.mrb[33].mxu1  ;;  %vm2250_vm11 = vcmp.gt.f32.partialorder %v4628_v46, 20.0 }
 0x85b   : > { %3254 = vpow2.f32 %v2258_v17  ;;  %v2243_v57 = vmin.f32 %v4631_v59, 20.0  ;;  %v4637_v52 = vadd.f32 %v2223_v63, %v2124_v19  ;;  %vm2251_vm13 = vcmp.gt.f32.partialorder %v4631_v59, 20.0 }
 0x85c   : > { %v2260_v12 = vmul.f32 1.442695, %v2242_v22  ;;  %v4640_v20 = vmul.f32 100.0, %v4634_v35 }
 0x85d   : > { %v2262_v13 = vmul.f32 1.442695, %v2243_v57  ;;  %v4643_v15 = vmul.f32 100.0, %v4637_v52  ;;  %v2227_v58 = vpop.f32.mrb[34].mxu1 }
 0x85e   : > { %3256 = vpow2.f32 %v2260_v12  ;;  %v2244_v18 = vmin.f32 %v4640_v20, 20.0  ;;  %v4646_v24 = vadd.f32 %v2227_v58, %v2129_v41  ;;  %v2229_v8 = vpop.f32.mrb[35].mxu1  ;;  %vm2252_vm6 = vcmp.gt.f32.partialorder %v4640_v20, 20.0  ;;  %v2890_v20 = vld [vmem:[%s4924_s3 + $0xe0] sm:$0xff] }
 0x85f   : > { %3258 = vpow2.f32 %v2262_v13  ;;  %v2245_v11 = vmin.f32 %v4643_v15, 20.0  ;;  %v4649_v14 = vadd.f32 %v2229_v8, %v2129_v41  ;;  %vm2253_vm8 = vcmp.gt.f32.partialorder %v4643_v15, 20.0  ;;  %v2893_v15 = vld [vmem:[%s4924_s3 + $0xf8] sm:$0xff] }
 0x860   : > { %v2264_v25 = vmul.f32 1.442695, %v2244_v18  ;;  %v4652_v62 = vmul.f32 100.0, %v4646_v24 }
 0x861   : > { %v2266_v29 = vmul.f32 1.442695, %v2245_v11  ;;  %v4655_v43 = vmul.f32 100.0, %v4649_v14 }
 0x862   : > { %3260 = vpow2.f32 %v2264_v25  ;;  %v2246_v32 = vmin.f32 %v4652_v62, 20.0  ;;  %vm2254_vm7 = vcmp.gt.f32.partialorder %v4652_v62, 20.0 }
 0x863   : > { %3262 = vpow2.f32 %v2266_v29  ;;  %v2247_v27 = vmin.f32 %v4655_v43, 20.0 }
 0x864   : > { %v3253_v36 = vpop.eup %3252  ;;  %v2268_v51 = vmul.f32 1.442695, %v2246_v32 }
 0x865   : > { %v3255_v44 = vpop.eup %3254  ;;  %v2272_v48 = vadd.f32 1.0, %v3253_v36  ;;  %v2270_v10 = vmul.f32 1.442695, %v2247_v27  ;;  %v2275_v53 = vmul.f32 -0.5, %v3253_v36  ;;  %v2278_v31 = vand.u32 2147483647, %v3253_v36 }
 0x866   : > { %3264 = vpow2.f32 %v2268_v51  ;;  %v2281_v9 = vadd.f32 1.0, %v3255_v44  ;;  %v2284_v47 = vmul.f32 -0.5, %v3255_v44  ;;  %v2287_v37 = vand.u32 2147483647, %v3255_v44 }
 0x867   : > { %3266 = vlog2.f32 %v2272_v48  ;;  %v2276_v2 = vadd.f32 1.0, %v2275_v53  ;;  %vm4664_vm9 = vcmp.lt.f32.partialorder %v2278_v31, 0.0004427343 }
 0x868   : > { %v3257_v38 = vpop.eup %3256  ;;  %3268 = vpow2.f32 %v2270_v10  ;;  %v2285_v34 = vadd.f32 1.0, %v2284_v47  ;;  %vm4676_vm14 = vcmp.lt.f32.partialorder %v2287_v37, 0.0004427343 }
 0x869   : > { %v3259_v49 = vpop.eup %3258  ;;  %v2290_v54 = vadd.f32 1.0, %v3257_v38  ;;  %3270 = vlog2.f32 %v2281_v9  ;;  %v2293_v26 = vmul.f32 -0.5, %v3257_v38  ;;  %v2296_v61 = vand.u32 2147483647, %v3257_v38 }
 0x86a   : > { %v2299_v4 = vadd.f32 1.0, %v3259_v49  ;;  %v2302_v30 = vmul.f32 -0.5, %v3259_v49  ;;  %v2277_v33 = vmul.f32 %v3253_v36, %v2276_v2  ;;  %v2305_v22 = vand.u32 2147483647, %v3259_v49 }
 0x86b   : > { %3272 = vlog2.f32 %v2290_v54  ;;  %v2294_v56 = vadd.f32 1.0, %v2293_v26  ;;  %v2286_v57 = vmul.f32 %v3255_v44, %v2285_v34  ;;  %vm4683_vm15 = vcmp.lt.f32.partialorder %v2296_v61, 0.0004427343 }
 0x86c   : > { %v3261_v7 = vpop.eup %3260  ;;  %3274 = vlog2.f32 %v2299_v4  ;;  %v2303_v45 = vadd.f32 1.0, %v2302_v30  ;;  %vm4688_vm0 = vcmp.lt.f32.partialorder %v2305_v22, 0.0004427343 }
 0x86d   : > { %v4659_v28 = vpop.eup %3262  ;;  %v2308_v21 = vadd.f32 1.0, %v3261_v7  ;;  %v2311_v6 = vmul.f32 -0.5, %v3261_v7  ;;  %v2295_v18 = vmul.f32 %v3257_v38, %v2294_v56  ;;  %v2314_v11 = vand.u32 2147483647, %v3261_v7 }
 0x86e   : > { %v2317_v55 = vadd.f32 1.0, %v4659_v28  ;;  %v2320_v63 = vmul.f32 -0.5, %v4659_v28  ;;  %v2304_v27 = vmul.f32 %v3259_v49, %v2303_v45  ;;  %v2323_v26 = vand.u32 2147483647, %v4659_v28 }
 0x86f   : > { %3276 = vlog2.f32 %v2308_v21  ;;  %v2312_v29 = vadd.f32 1.0, %v2311_v6  ;;  %vm4697_vm1 = vcmp.lt.f32.partialorder %v2314_v11, 0.0004427343 }
 0x870   : > { %v4662_v42 = vpop.eup %3264  ;;  %3278 = vlog2.f32 %v2317_v55  ;;  %v2321_v10 = vadd.f32 1.0, %v2320_v63  ;;  %vm2324_vm3 = vcmp.lt.f32.partialorder %v2323_v26, 0.0004427343 }
 0x871   : > { %v3267_v0 = vpop.eup %3266  ;;  %v2326_v39 = vadd.f32 1.0, %v4662_v42  ;;  %v2329_v44 = vmul.f32 -0.5, %v4662_v42  ;;  %v2313_v30 = vmul.f32 %v3261_v7, %v2312_v29  ;;  %v2332_v2 = vand.u32 2147483647, %v4662_v42 }
 0x872   : > { %v4669_v19 = vpop.eup %3268  ;;  %v2274_v17 = vmul.f32 0.6931472, %v3267_v0  ;;  %v2322_v0 = vmul.f32 %v4659_v28, %v2321_v10 }
 0x873   : > { %3280 = vlog2.f32 %v2326_v39  ;;  %v2335_v41 = vadd.f32 1.0, %v4669_v19  ;;  %v3271_v13 = vpop.eup %3270  ;;  %v2338_v53 = vmul.f32 -0.5, %v4669_v19  ;;  %v2330_v56 = vadd.f32 1.0, %v2329_v44 }
 0x874   : > { %v2280_v58 = vsel %vm4664_vm9, %v2277_v33, %v2274_v17  ;;  %v2283_v32 = vmul.f32 0.6931472, %v3271_v13  ;;  %v2341_v46 = vand.u32 2147483647, %v4669_v19  ;;  %vm2333_vm4 = vcmp.lt.f32.partialorder %v2332_v2, 0.0004427343 }
 0x875   : > { %v3273_v25 = vpop.eup %3272  ;;  %3282 = vlog2.f32 %v2335_v41  ;;  %v2344_v9 = vmul.f32 0.01, %v2280_v58  ;;  %v2339_v39 = vadd.f32 1.0, %v2338_v53  ;;  %v2331_v22 = vmul.f32 %v4662_v42, %v2330_v56 }
 0x876   : > { %v3275_v36 = vpop.eup %3274  ;;  %v2292_v51 = vmul.f32 0.6931472, %v3273_v25  ;;  %v2289_v38 = vsel %vm4676_vm14, %v2286_v57, %v2283_v32  ;;  %vm2342_vm5 = vcmp.lt.f32.partialorder %v2341_v46, 0.0004427343  ;;  %vm2255_vm9 = vcmp.gt.f32.partialorder %v4655_v43, 20.0 }
 0x877   : > { %v2301_v54 = vmul.f32 0.6931472, %v3275_v36  ;;  %v2345_v47 = vmul.f32 0.01, %v2289_v38  ;;  %v2352_v5 = vsel %vm2248_vm10, %v4611_v23, %v2344_v9  ;;  %v2340_v50 = vmul.f32 %v4669_v19, %v2339_v39 }
 0x878   : > { %v2298_v49 = vsel %vm4683_vm15, %v2295_v18, %v2292_v51 }
 0x879   : > { %v3277_v31 = vpop.eup %3276  ;;  %v2346_v21 = vmul.f32 0.01, %v2298_v49  ;;  %v2307_v55 = vsel %vm4688_vm0, %v2304_v27, %v2301_v54  ;;  %v2353_v33 = vsel %vm2249_vm12, %v4613_v60, %v2345_v47  ;;  %v2378_v27 = vpop.permute.xlu1 %2377 }
 0x87a   : > { %v3279_v34 = vpop.eup %3278  ;;  %v2310_v37 = vmul.f32 0.6931472, %v3277_v31  ;;  %v2347_v61 = vmul.f32 0.01, %v2307_v55 }
 0x87b   : > { %v2354_v6 = vsel %vm2250_vm11, %v4622_v16, %v2346_v21  ;;  %v2319_v7 = vmul.f32 0.6931472, %v3279_v34 }
 0x87c   : > { %v2967_v45 = vpack.c.bf16 %v2354_v6, %v2352_v5  ;;  %v2316_v17 = vsel %vm4697_vm1, %v2313_v30, %v2310_v37  ;;  %v2355_v28 = vsel %vm2251_vm13, %v4625_v3, %v2347_v61 }
 0x87d   : > { %v3281_v40 = vpop.eup %3280  ;;  %v2965_v23 = vpack.c.bf16 %v2355_v28, %v2353_v33  ;;  %v2325_v63 = vsel %vm2324_vm3, %v2322_v0, %v2319_v7  ;;  %v2348_v12 = vmul.f32 0.01, %v2316_v17  ;;  %v2388_v37 = vpop.permute.xlu1 %2387 }
 0x87e   : > { %v2328_v16 = vmul.f32 0.6931472, %v3281_v40  ;;  %v2349_v3 = vmul.f32 0.01, %v2325_v63 }
 0x87f   : > { %v3283_v57 = vpop.eup %3282  ;;  %2966 = vmatprep.subr.bf16.mxu0 %v2965_v23  ;;  %v2356_v42 = vsel %vm2252_vm6, %v4634_v35, %v2348_v12  ;;  %v2891_v35 = vld [vmem:[%s4924_s3 + $0xe8] sm:$0xff] }
 0x880   : > { %v2334_v41 = vsel %vm2333_vm4, %v2331_v22, %v2328_v16  ;;  %2968 = vmatpush1.bf16.msra.mxu0 %v2967_v45  ;;  %v2337_v60 = vmul.f32 0.6931472, %v3283_v57  ;;  %v2357_v19 = vsel %vm2253_vm8, %v4637_v52, %v2349_v3  ;;  %v2892_v52 = vld [vmem:[%s4924_s3 + $0xf0] sm:$0xff] }
 0x881   : > { %v2350_v59 = vmul.f32 0.01, %v2334_v41 }
 0x882   : > { %v2343_v13 = vsel %vm2342_vm5, %v2340_v50, %v2337_v60 }
 0x883   : > { %v2358_v58 = vsel %vm2254_vm7, %v4646_v24, %v2350_v59  ;;  %v2351_v18 = vmul.f32 0.01, %v2343_v13  ;;  %v2373_v24 = vpop.permute.xlu0 %2372 }
 0x884   : > { %v2971_v8 = vpack.c.bf16 %v2358_v58, %v2356_v42 }
 0x885   : > { %v2359_v11 = vsel %vm2255_vm9, %v4649_v14, %v2351_v18 }
 0x886   : > { %v2969_v25 = vpack.c.bf16 %v2359_v11, %v2357_v19 }
 0x887   : > { %v2383_v53 = vpop.permute.xlu0 %2382 }
 0x888   : > { %2970 = vmatprep.subr.bf16.mxu0 %v2969_v25 }
 0x889   : > { %2972 = vmatpush1.bf16.msra.mxu0 %v2971_v8 }
 0x88c   : > { %2898 = vmatmul.mubr.msk.f32.vlgmr.msra.gmra.mrb[28].mxu0 %vm576_vm2, %v2890_v20 }
 0x88d   : > { %2472 = vmatprep.mubr.f32.mxu0 %v3380_v1 }
 0x890   : > { %2899 = vmatmul.mubr.msk.f32.gmra.mrb[30].mxu0 %vm576_vm2, %v2891_v35 }
 0x891   : > { %2478 = vmatprep.mubr.f32.mxu0 %v3380_v1 }
 0x894   : > { %2900 = vmatmul.mubr.msk.f32.gmra.mrb[32].mxu0 %vm576_vm2, %v2892_v52 }
 0x895   : > { %2484 = vmatprep.mubr.f32.mxu0 %v3380_v1 }
 0x898   : > { %2901 = vmatmul.mubr.msk.f32.gmra.mrb[34].mxu0 %vm576_vm2, %v2893_v15 }
 0x95f   : > { %v2468_v14 = vpop.f32.mrb[28].mxu0 }
 0x960   : > { %v4750_v62 = vadd.f32 %v2468_v14, %v2373_v24  ;;  %v2470_v43 = vpop.f32.mrb[29].mxu0 }
 0x961   : > { %v4752_v29 = vadd.f32 %v2470_v43, %v2373_v24 }
 0x962   : > { %v4755_v32 = vmul.f32 100.0, %v4750_v62 }
 0x963   : > { %v4758_v36 = vmul.f32 100.0, %v4752_v29  ;;  %v2474_v1 = vpop.f32.mrb[30].mxu0 }
 0x964   : > { %v2499_v51 = vmin.f32 %v4755_v32, 20.0  ;;  %v4761_v44 = vadd.f32 %v2474_v1, %v2378_v27  ;;  %v2476_v48 = vpop.f32.mrb[31].mxu0  ;;  %vm2507_vm11 = vcmp.gt.f32.partialorder %v4755_v32, 20.0 }
 0x965   : > { %v2500_v10 = vmin.f32 %v4758_v36, 20.0  ;;  %v4764_v9 = vadd.f32 %v2476_v48, %v2378_v27  ;;  %vm2508_vm13 = vcmp.gt.f32.partialorder %v4758_v36, 20.0 }
 0x966   : > { %v2515_v38 = vmul.f32 1.442695, %v2499_v51  ;;  %v4767_v54 = vmul.f32 100.0, %v4761_v44 }
 0x967   : > { %v2517_v49 = vmul.f32 1.442695, %v2500_v10  ;;  %v4770_v4 = vmul.f32 100.0, %v4764_v9  ;;  %v2480_v47 = vpop.f32.mrb[32].mxu0 }
 0x968   : > { %3284 = vpow2.f32 %v2515_v38  ;;  %v2501_v26 = vmin.f32 %v4767_v54, 20.0  ;;  %v4773_v31 = vadd.f32 %v2480_v47, %v2383_v53  ;;  %v2482_v21 = vpop.f32.mrb[33].mxu0  ;;  %vm2509_vm12 = vcmp.gt.f32.partialorder %v4767_v54, 20.0 }
 0x969   : > { %3286 = vpow2.f32 %v2517_v49  ;;  %v2502_v30 = vmin.f32 %v4770_v4, 20.0  ;;  %v4776_v2 = vadd.f32 %v2482_v21, %v2383_v53  ;;  %vm2510_vm14 = vcmp.gt.f32.partialorder %v4770_v4, 20.0 }
 0x96a   : > { %v2519_v55 = vmul.f32 1.442695, %v2501_v26  ;;  %v4779_v34 = vmul.f32 100.0, %v4773_v31 }
 0x96b   : > { %v2521_v56 = vmul.f32 1.442695, %v2502_v30  ;;  %v4782_v61 = vmul.f32 100.0, %v4776_v2  ;;  %v2486_v0 = vpop.f32.mrb[34].mxu0 }
 0x96c   : > { %3288 = vpow2.f32 %v2519_v55  ;;  %v2503_v5 = vmin.f32 %v4779_v34, 20.0  ;;  %v4785_v6 = vadd.f32 %v2486_v0, %v2388_v37  ;;  %v2488_v7 = vpop.f32.mrb[35].mxu0  ;;  %vm2511_vm7 = vcmp.gt.f32.partialorder %v4779_v34, 20.0 }
 0x96d   : > { %3290 = vpow2.f32 %v2521_v56  ;;  %v2504_v39 = vmin.f32 %v4782_v61, 20.0  ;;  %v4788_v45 = vadd.f32 %v2488_v7, %v2388_v37  ;;  %vm2512_vm9 = vcmp.gt.f32.partialorder %v4782_v61, 20.0 }
 0x96e   : > { %v2523_v17 = vmul.f32 1.442695, %v2503_v5  ;;  %v4791_v33 = vmul.f32 100.0, %v4785_v6  ;;  %v2626_v34 = vlaneseq }
 0x96f   : > { %v2525_v28 = vmul.f32 1.442695, %v2504_v39  ;;  %v4794_v40 = vmul.f32 100.0, %v4788_v45 }
 0x970   : > { %3292 = vpow2.f32 %v2523_v17  ;;  %v2505_v23 = vmin.f32 %v4791_v33, 20.0  ;;  %vm2513_vm8 = vcmp.gt.f32.partialorder %v4791_v33, 20.0  ;;  %v2627_v61 = vshrl.u32 %v2626_v34, 7 }
 0x971   : > { %3294 = vpow2.f32 %v2525_v28  ;;  %v2506_v46 = vmin.f32 %v4794_v40, 20.0 }
 0x972   : > { %v3285_v16 = vpop.eup %3284  ;;  %v2527_v22 = vmul.f32 1.442695, %v2505_v23 }
 0x973   : > { %v3287_v63 = vpop.eup %3286  ;;  %v2531_v57 = vadd.f32 1.0, %v3285_v16  ;;  %v2529_v12 = vmul.f32 1.442695, %v2506_v46  ;;  %v2534_v3 = vmul.f32 -0.5, %v3285_v16  ;;  %v2537_v19 = vand.u32 2147483647, %v3285_v16 }
 0x974   : > { %3296 = vpow2.f32 %v2527_v22  ;;  %v2540_v41 = vadd.f32 1.0, %v3287_v63  ;;  %v2543_v42 = vmul.f32 -0.5, %v3287_v63  ;;  %v2546_v15 = vand.u32 2147483647, %v3287_v63 }
 0x975   : > { %3298 = vlog2.f32 %v2531_v57  ;;  %v2535_v20 = vadd.f32 1.0, %v2534_v3  ;;  %vm4803_vm10 = vcmp.lt.f32.partialorder %v2537_v19, 0.0004427343 }
 0x976   : > { %v3289_v60 = vpop.eup %3288  ;;  %3300 = vpow2.f32 %v2529_v12  ;;  %v2544_v52 = vadd.f32 1.0, %v2543_v42  ;;  %vm4815_vm15 = vcmp.lt.f32.partialorder %v2546_v15, 0.0004427343 }
 0x977   : > { %v3291_v50 = vpop.eup %3290  ;;  %v2549_v59 = vadd.f32 1.0, %v3289_v60  ;;  %3302 = vlog2.f32 %v2540_v41  ;;  %v2552_v18 = vmul.f32 -0.5, %v3289_v60  ;;  %v2555_v43 = vand.u32 2147483647, %v3289_v60 }
 0x978   : > { %v2558_v13 = vadd.f32 1.0, %v3291_v50  ;;  %v2561_v25 = vmul.f32 -0.5, %v3291_v50  ;;  %v2536_v49 = vmul.f32 %v3285_v16, %v2535_v20  ;;  %v2564_v47 = vand.u32 2147483647, %v3291_v50 }
 0x979   : > { %3304 = vlog2.f32 %v2549_v59  ;;  %v2553_v14 = vadd.f32 1.0, %v2552_v18  ;;  %v2545_v21 = vmul.f32 %v3287_v63, %v2544_v52  ;;  %vm4822_vm0 = vcmp.lt.f32.partialorder %v2555_v43, 0.0004427343 }
 0x97a   : > { %v3293_v58 = vpop.eup %3292  ;;  %3306 = vlog2.f32 %v2558_v13  ;;  %v2562_v10 = vadd.f32 1.0, %v2561_v25  ;;  %vm4827_vm1 = vcmp.lt.f32.partialorder %v2564_v47, 0.0004427343 }
 0x97b   : > { %v4798_v8 = vpop.eup %3294  ;;  %v2567_v11 = vadd.f32 1.0, %v3293_v58  ;;  %v2570_v51 = vmul.f32 -0.5, %v3293_v58  ;;  %v2554_v0 = vmul.f32 %v3289_v60, %v2553_v14  ;;  %v2573_v7 = vand.u32 2147483647, %v3293_v58 }
 0x97c   : > { %v2576_v35 = vadd.f32 1.0, %v4798_v8  ;;  %v2579_v26 = vmul.f32 -0.5, %v4798_v8  ;;  %v2563_v23 = vmul.f32 %v3291_v50, %v2562_v10  ;;  %v2582_v42 = vand.u32 2147483647, %v4798_v8 }
 0x97d   : > { %3308 = vlog2.f32 %v2567_v11  ;;  %v2571_v17 = vadd.f32 1.0, %v2570_v51  ;;  %vm4836_vm3 = vcmp.lt.f32.partialorder %v2573_v7, 0.0004427343 }
 0x97e   : > { %v4801_v24 = vpop.eup %3296  ;;  %3310 = vlog2.f32 %v2576_v35  ;;  %v2580_v57 = vadd.f32 1.0, %v2579_v26  ;;  %vm2583_vm4 = vcmp.lt.f32.partialorder %v2582_v42, 0.0004427343 }
 0x97f   : > { %v3299_v27 = vpop.eup %3298  ;;  %v2585_v48 = vadd.f32 1.0, %v4801_v24  ;;  %v2588_v22 = vmul.f32 -0.5, %v4801_v24  ;;  %v2572_v11 = vmul.f32 %v3293_v58, %v2571_v17  ;;  %v2591_v25 = vand.u32 2147483647, %v4801_v24 }
 0x980   : > { %v4808_v38 = vpop.eup %3300  ;;  %v2533_v53 = vmul.f32 0.6931472, %v3299_v27  ;;  %v2581_v43 = vmul.f32 %v4798_v8, %v2580_v57 }
 0x981   : > { %3312 = vlog2.f32 %v2585_v48  ;;  %v2594_v55 = vadd.f32 1.0, %v4808_v38  ;;  %v3303_v37 = vpop.eup %3302  ;;  %v2597_v59 = vmul.f32 -0.5, %v4808_v38  ;;  %v2589_v15 = vadd.f32 1.0, %v2588_v22 }
 0x982   : > { %v2539_v56 = vsel %vm4803_vm10, %v2536_v49, %v2533_v53  ;;  %v2542_v28 = vmul.f32 0.6931472, %v3303_v37  ;;  %v2600_v54 = vand.u32 2147483647, %v4808_v38  ;;  %vm2592_vm5 = vcmp.lt.f32.partialorder %v2591_v25, 0.0004427343 }
 0x983   : > { %v3305_v39 = vpop.eup %3304  ;;  %3314 = vlog2.f32 %v2594_v55  ;;  %v2603_v12 = vmul.f32 0.01, %v2539_v56  ;;  %v2598_v51 = vadd.f32 1.0, %v2597_v59  ;;  %v2590_v49 = vmul.f32 %v4801_v24, %v2589_v15 }
 0x984   : > { %v3307_v46 = vpop.eup %3306  ;;  %v2551_v16 = vmul.f32 0.6931472, %v3305_v39  ;;  %v2548_v41 = vsel %vm4815_vm15, %v2545_v21, %v2542_v28  ;;  %vm2601_vm6 = vcmp.lt.f32.partialorder %v2600_v54, 0.0004427343  ;;  %vm2514_vm10 = vcmp.gt.f32.partialorder %v4794_v40, 20.0  ;;  %v2624_v40 = vpop.permute.xlu0 %2623 }
 0x985   : > { %v2560_v60 = vmul.f32 0.6931472, %v3307_v46  ;;  %v2604_v13 = vmul.f32 0.01, %v2548_v41  ;;  %v2611_v27 = vsel %vm2507_vm11, %v4750_v62, %v2603_v12  ;;  %v2599_v36 = vmul.f32 %v4808_v38, %v2598_v51 }
 0x986   : > { %v2557_v50 = vsel %vm4822_vm0, %v2554_v0, %v2551_v16  ;;  %v2628_v39 = vsub.s32 0, %v2627_v61 }
 0x987   : > { %v3309_v18 = vpop.eup %3308  ;;  %v2605_v19 = vmul.f32 0.01, %v2557_v50  ;;  %v2566_v20 = vsel %vm4827_vm1, %v2563_v23, %v2560_v60  ;;  %v2612_v53 = vsel %vm2508_vm13, %v4752_v29, %v2604_v13 }
 0x988   : > { %v3311_v35 = vpop.eup %3310  ;;  %v2569_v52 = vmul.f32 0.6931472, %v3309_v18  ;;  %v2606_v14 = vmul.f32 0.01, %v2566_v20  ;;  %v2629_v17 = vrot.slane %v2624_v40, %v2628_v39 }
 0x989   : > { %v2613_v1 = vsel %vm2509_vm12, %v4761_v44, %v2605_v19  ;;  %v2578_v58 = vmul.f32 0.6931472, %v3311_v35 }
 0x98a   : > { %v2975_v48 = vpack.c.bf16 %v2613_v1, %v2611_v27  ;;  %v2575_v10 = vsel %vm4836_vm3, %v2572_v11, %v2569_v52  ;;  %v2614_v8 = vsel %vm2510_vm14, %v4764_v9, %v2606_v14 }
 0x98b   : > { %v3313_v32 = vpop.eup %3312  ;;  %v2973_v62 = vpack.c.bf16 %v2614_v8, %v2612_v53  ;;  %v2584_v47 = vsel %vm2583_vm4, %v2581_v43, %v2578_v58  ;;  %v2607_v21 = vmul.f32 0.01, %v2575_v10 }
 0x98c   : > { %v2587_v44 = vmul.f32 0.6931472, %v3313_v32  ;;  %v2608_v9 = vmul.f32 0.01, %v2584_v47 }
 0x98d   : > { %v3315_v26 = vpop.eup %3314  ;;  %2974 = vmatprep.subr.bf16.mxu1 %v2973_v62  ;;  %v2615_v24 = vsel %vm2511_vm7, %v4773_v31, %v2607_v21  ;;  %v2619_v31 = vld [vmem:[%s4926_s5] sm:$0x1] }
 0x98e   : > { %v2593_v30 = vsel %vm2592_vm5, %v2590_v49, %v2587_v44  ;;  %2976 = vmatpush1.bf16.msra.mxu1 %v2975_v48  ;;  %v2596_v29 = vmul.f32 0.6931472, %v3315_v26  ;;  %v2616_v38 = vsel %vm2512_vm9, %v4776_v2, %v2608_v9 }
 0x98f   : > { %v2609_v4 = vmul.f32 0.01, %v2593_v30 }
 0x990   : > { %v2602_v55 = vsel %vm2601_vm6, %v2599_v36, %v2596_v29 }
 0x991   : > { %v2617_v37 = vsel %vm2513_vm8, %v4785_v6, %v2609_v4  ;;  %v2610_v56 = vmul.f32 0.01, %v2602_v55  ;;  %v3382_v6 = vmov 1966171168  }
 0x992   : > { %v2979_v0 = vpack.c.bf16 %v2617_v37, %v2615_v24  ;;  %v2708_v33 = vunpack.c.l.s4 %v3382_v6 }
 0x993   : > { %v2618_v5 = vsel %vm2514_vm10, %v4788_v45, %v2610_v56 }
 0x994   : > { %v2977_v7 = vpack.c.bf16 %v2618_v5, %v2616_v38  ;;  %v2709_v2 = vunpack.c.0.s8 %v2708_v33 }
 0x996   : > { %2978 = vmatprep.subr.bf16.mxu1 %v2977_v7  ;;  %v2712_v16 = vsub.s32 %v2709_v2, %v2627_v61 }
 0x997   : > { %2980 = vmatpush1.bf16.msra.mxu1 %v2979_v0 }
 0x99a   : > { %2902 = vmatmul.mubr.msk.f32.vlgmr.msra.gmra.mrb[36].mxu1 %vm576_vm2, %v2619_v31  ;;  %vm2724_vm2 = vcmp.lt.s32.totalorder %v2626_v34, 256 }
 0xa6d   : > { %v2699_v45 = vpop.f32.mrb[36].mxu1 }
 0xa6e   : > { %v2700_v28 = vadd.f32 %v2699_v45, %v2629_v17  ;;  %v2701_v23 = vpop.f32.mrb[37].mxu1 }
 0xa6f   : > { %v2702_v46 = vadd.f32 %v2701_v23, %v2629_v17 }
 0xa71   : > { %v2706_v22 = vcombine.low %v2700_v28, %v2702_v46 }
 0xa73   : > { %v2713_v63 = vrot.slane %v2706_v22, %v2712_v16 }
 0xa75   : > { %v2720_v57 = vrot.slane %v2713_v63, %v2712_v16 }
 0xa77   : > { %2726 = vst.msk [vmem:[%s274_s18] sm:$0x3] %vm2724_vm2, %v2720_v57 }
 0xa78   : > { %3329 = shalt.err (!%p3326_p3)
}
 0xa79   : > { %s3330_s9 = scalar_lea.hbm %s4879_s22, 32  ;;  %s3334_s16 = scalar_lea.hbm %s4928_s7, 128 }
 0xa7a   : > { %p3331_p4 = scmp.ne.s32.totalorder %s4879_s22, %s3330_s9  ;;  %p3335_p9 = scmp.lt.u32.totalorder %s4879_s22, %s4928_s7 }
 0xa7b   : > { %p3336_p10 = scmp.lt.u32.totalorder %s3334_s16, %s3330_s9  ;;  %p3338_p12 = scmp.lt.u32.totalorder %s3330_s9, %s4879_s22 }
 0xa7c   : > { %p3332_p7 = pnand %p3331_p4, %p3465_p5 }
 0xa7d   : > { %p3337_p11 = por %p3336_p10, %p3335_p9 }
 0xa7e   : > { %p3333_p8 = pneg %p3332_p7 }
 0xa7f   : > { %p3339_p13 = por %p3338_p12, %p3337_p11 }
 0xa81   : > { %p3340_p0 = pnand %p3339_p13, %p3333_p8 }
 0xa83   : > { %3343 = shalt.err (!%p3340_p0)
}
 0xa84   : > { %2983 = dma.vmem_to_hbm [thread:$0]  (%p3465_p5), %s4881_s19, 32, %s4879_s22, %s2728_s23  }
 0xa85 PF: > { %p2989_p1 = scmp.ge.s32.totalorder %s3378_s29, 2  ;;  %s2754_s18 = sand.u32 1, %s3366_s26  }
 0xa86   : > { %s2755_s20 = scalar_lea.sflag [#allocation4], %s2754_s18 }
 0xa87   : > { %p2986_p2 = pnand %p2989_p1, %p3469_p6 }
 0xa89   : > { %3361 = dma.done.wait (!%p2986_p2), %s2755_s20, 32  }
 0xa8a   : > { %3363 = vsyncadd (!%p2986_p2), %s2755_s20, 4294967264  ;;  %p19_p3 = scmp.ge.s32.totalorder %s3452_s8, 6   ;;  %s5027_s26 = smov %s3370_s27 }
 0xa8b   : > { %s5028_s27 = smov %s3374_s28  ;;  %s5029_s28 = smov %s3463_s11 }
 0xa8c   : > { %s5030_s29 = smov %s3452_s8  ;;  %21 = sbr.rel (!%p19_p3) target bundleno = 6 (0x6), region = 97 }
 0xa93   :  { %2760 = vsyncpa [#allocation4], 1 }
 0xa94   :  { %2762 = vsyncpa [#allocation4 + $0x1], 1 }

</bundles_post_ra>
